<compile_context>
chip_gen: v7x
topology: tpu7x:2x2x1
jax: 0.10.0
libtpu: 0.0.40
codegen_flags: <defaults>
</compile_context>

<pallas_src>
import functools

import jax
import jax.numpy as jnp
from jax.experimental import pallas as pl
from jax.experimental.pallas import tpu as pltpu


def gru_fc_kernel(x_ref, wih_ref, whh_ref, bgi_ref, bhn_ref, fcw_ref, fcb_ref,
                  out_ref, *, seq_len, batch):
    """Full GRU-over-time + final Linear in one kernel invocation.

    Refs (all whole-array VMEM blocks):
      x_ref  : (T*B, I)  time-major, flattened input
      wih_ref: (I, 3H)   input->gates weights, gate order [r | z | n] (torch order)
      whh_ref: (H, 3H)   hidden->gates weights, gate order [r | z | n]
      bgi_ref: (1, 3H)   pre-folded bias [b_ir+b_hr | b_iz+b_hz | b_in]
      bhn_ref: (1, H)    n-gate hidden bias b_hn (kept inside r * (.))
      fcw_ref: (H, O)    final Linear weight (transposed)
      fcb_ref: (1, O)    final Linear bias
      out_ref: (B, O)    logits from the LAST timestep only
    """
    hidden = whh_ref.shape[0]

    # Hoisted input projection: one big matmul, independent of the recurrence,
    # so the scheduler can overlap it with the serial h-chain.
    x_all = x_ref[...].astype(jnp.float32)                            # (T*B, I)
    gi_all = (jnp.dot(x_all, wih_ref[...],
                      preferred_element_type=jnp.float32)
              + bgi_ref[...])                                         # (T*B, 3H)

    whh = whh_ref[...]                                                # (H, 3H)
    b_hn = bhn_ref[...]                                               # (1, H)

    # Fully-unrolled time recurrence (T is small & static). Equivalent to
    # lax.fori_loop(..., unroll=True): all slice starts are static and h is
    # carried in vregs; only h @ W_hh sits on the per-step critical path.
    h = jnp.zeros((batch, hidden), jnp.float32)
    for t in range(seq_len):
        gi = gi_all[t * batch:(t + 1) * batch, :]                     # (B, 3H)
        gh = jnp.dot(h, whh, preferred_element_type=jnp.float32)      # (B, 3H)
        i_r = gi[:, 0 * hidden:1 * hidden]
        i_z = gi[:, 1 * hidden:2 * hidden]
        i_n = gi[:, 2 * hidden:3 * hidden]
        h_r = gh[:, 0 * hidden:1 * hidden]
        h_z = gh[:, 1 * hidden:2 * hidden]
        h_n = gh[:, 2 * hidden:3 * hidden]
        r = jax.nn.sigmoid(i_r + h_r)
        z = jax.nn.sigmoid(i_z + h_z)
        n = jnp.tanh(i_n + r * (h_n + b_hn))
        h = (1.0 - z) * n + z * h

    # Final Linear on the last hidden state (once, after the loop).
    logits = jnp.dot(h, fcw_ref[...], preferred_element_type=jnp.float32)
    out_ref[...] = (logits + fcb_ref[...]).astype(out_ref.dtype)


@jax.jit
def gru_model_forward(x, params):
    """x: (B, T, I) float32 (batch_first, as in the PyTorch module).
    Returns (B, O) logits of fc(gru(x)[:, -1, :])."""
    B, T, I = x.shape
    wih, whh, bih, bhh, fcw, fcb = (
        params["w_ih"], params["w_hh"], params["b_ih"], params["b_hh"],
        params["fc_w"], params["fc_b"],
    )
    H = whh.shape[0]
    O = fcw.shape[1]

    # Layout plumbing (wrapper-side only): time-major, then flatten to (T*B, I)
    # so the kernel's input projection is one lane-dense matmul.
    x_flat = jnp.transpose(x, (1, 0, 2)).reshape(T * B, I)

    # Pre-fold the r/z biases (b_ih + b_hh); keep the n-gate hidden bias
    # separate because it must stay inside r * (W_hn h + b_hn).
    b_gi = jnp.concatenate(
        [bih[:, :2 * H] + bhh[:, :2 * H], bih[:, 2 * H:]], axis=1)    # (1, 3H)
    b_hn = bhh[:, 2 * H:]                                             # (1, H)

    kernel = functools.partial(gru_fc_kernel, seq_len=T, batch=B)
    out = pl.pallas_call(
        kernel,
        out_shape=jax.ShapeDtypeStruct((B, O), jnp.float32),
        in_specs=[pl.BlockSpec(memory_space=pltpu.MemorySpace.VMEM)
                  for _ in range(7)],
        out_specs=pl.BlockSpec(memory_space=pltpu.MemorySpace.VMEM),
    )(x_flat, wih, whh, b_gi, b_hn, fcw, fcb)
    return out


def init_params(key, input_size, hidden_size, output_size):
    """Deterministic init mirroring torch.nn.GRU / nn.Linear shapes.
    Stored transposed for right-multiplication in the kernel."""
    k = 1.0 / jnp.sqrt(hidden_size)
    keys = jax.random.split(key, 6)
    w_ih = jax.random.uniform(keys[0], (input_size, 3 * hidden_size),
                              jnp.float32, -k, k)
    w_hh = jax.random.uniform(keys[1], (hidden_size, 3 * hidden_size),
                              jnp.float32, -k, k)
    b_ih = jax.random.uniform(keys[2], (1, 3 * hidden_size), jnp.float32, -k, k)
    b_hh = jax.random.uniform(keys[3], (1, 3 * hidden_size), jnp.float32, -k, k)
    fc_w = jax.random.uniform(keys[4], (hidden_size, output_size),
                              jnp.float32, -k, k)
    fc_b = jax.random.uniform(keys[5], (1, output_size), jnp.float32, -k, k)
    return dict(w_ih=w_ih, w_hh=w_hh, b_ih=b_ih, b_hh=b_hh, fc_w=fc_w, fc_b=fc_b)


def gru_model_reference(x, params):
    """Pure-JAX reference implementing torch.nn.GRU semantics (gate order r,z,n)."""
    wih, whh, bih, bhh = params["w_ih"], params["w_hh"], params["b_ih"], params["b_hh"]
    H = whh.shape[0]
    B = x.shape[0]

    def step(h, x_t):
        gi = x_t @ wih + bih
        gh = h @ whh + bhh
        i_r, i_z, i_n = gi[:, :H], gi[:, H:2 * H], gi[:, 2 * H:]
        h_r, h_z, h_n = gh[:, :H], gh[:, H:2 * H], gh[:, 2 * H:]
        r = jax.nn.sigmoid(i_r + h_r)
        z = jax.nn.sigmoid(i_z + h_z)
        n = jnp.tanh(i_n + r * h_n)
        return (1.0 - z) * n + z * h, None

    h0 = jnp.zeros((B, H), jnp.float32)
    h_last, _ = jax.lax.scan(step, h0, jnp.transpose(x, (1, 0, 2)))
    return h_last @ params["fc_w"] + params["fc_b"]


if __name__ == "__main__":
    # Small shapes consistent with the module: vocab_size=45 features per step.
    # batch=8 keeps the per-timestep sublane slices of gi_all 8-aligned.
    batch, seq_len = 8, 8
    input_size = 45        # == vocab_size
    hidden_size = 128
    output_size = 45       # == vocab_size

    key = jax.random.PRNGKey(0)
    kx, kp = jax.random.split(key)
    x = jax.random.normal(kx, (batch, seq_len, input_size), jnp.float32)
    params = init_params(kp, input_size, hidden_size, output_size)

    out = jax.block_until_ready(gru_model_forward(x, params))
    ref = jax.block_until_ready(gru_model_reference(x, params))

    assert out.shape == (batch, output_size)
    assert jnp.max(jnp.abs(out - ref)) < 1e-3, "Pallas GRU deviates from reference"

    print("KERNEL_OK")
</pallas_src>

<mosaic_0001>
module attributes {stable_mosaic.version = 11 : i64} {
  func.func @gru_fc_kernel(%arg0: memref<64x45xf32, #tpu.memory_space<vmem>>, %arg1: memref<45x384xf32, #tpu.memory_space<vmem>>, %arg2: memref<128x384xf32, #tpu.memory_space<vmem>>, %arg3: memref<1x384xf32, #tpu.memory_space<vmem>>, %arg4: memref<1x128xf32, #tpu.memory_space<vmem>>, %arg5: memref<128x45xf32, #tpu.memory_space<vmem>>, %arg6: memref<1x45xf32, #tpu.memory_space<vmem>>, %arg7: memref<8x45xf32, #tpu.memory_space<vmem>>) attributes {dimension_semantics = [], scalar_prefetch = 0 : i64, scratch_operands = 0 : i64, tpu.core_type = #tpu.core_type<tc>} {
    %c0 = arith.constant 0 : index
    %c0_0 = arith.constant 0 : index
    %0 = vector.load %arg0[%c0, %c0_0] : memref<64x45xf32, #tpu.memory_space<vmem>>, vector<64x45xf32>
    %c0_1 = arith.constant 0 : index
    %c0_2 = arith.constant 0 : index
    %1 = vector.load %arg1[%c0_1, %c0_2] : memref<45x384xf32, #tpu.memory_space<vmem>>, vector<45x384xf32>
    %cst = arith.constant dense<0.000000e+00> : vector<64x384xf32>
    %2 = tpu.matmul %0, %1, %cst {dimension_numbers = #tpu.dot_dimension_numbers<[1], [0], [0], [1], [0, 0, 1, 1], [], []>} : vector<64x45xf32>, vector<45x384xf32>, vector<64x384xf32> -> vector<64x384xf32>
    %c0_3 = arith.constant 0 : index
    %c0_4 = arith.constant 0 : index
    %3 = vector.load %arg3[%c0_3, %c0_4] : memref<1x384xf32, #tpu.memory_space<vmem>>, vector<1x384xf32>
    %4 = vector.broadcast %3 : vector<1x384xf32> to vector<64x384xf32>
    %5 = arith.addf %2, %4 : vector<64x384xf32>
    %c0_5 = arith.constant 0 : index
    %c0_6 = arith.constant 0 : index
    %6 = vector.load %arg2[%c0_5, %c0_6] : memref<128x384xf32, #tpu.memory_space<vmem>>, vector<128x384xf32>
    %c0_7 = arith.constant 0 : index
    %c0_8 = arith.constant 0 : index
    %7 = vector.load %arg4[%c0_7, %c0_8] : memref<1x128xf32, #tpu.memory_space<vmem>>, vector<1x128xf32>
    %cst_9 = arith.constant 0.000000e+00 : f32
    %8 = vector.broadcast %cst_9 : f32 to vector<8x128xf32>
    %9 = vector.extract_strided_slice %5 {offsets = [0, 0], sizes = [8, 384], strides = [1, 1]} : vector<64x384xf32> to vector<8x384xf32>
    %cst_10 = arith.constant dense<0.000000e+00> : vector<8x384xf32>
    %10 = tpu.matmul %8, %6, %cst_10 {dimension_numbers = #tpu.dot_dimension_numbers<[1], [0], [0], [1], [0, 0, 1, 1], [], []>} : vector<8x128xf32>, vector<128x384xf32>, vector<8x384xf32> -> vector<8x384xf32>
    %11 = vector.extract_strided_slice %9 {offsets = [0, 0], sizes = [8, 128], strides = [1, 1]} : vector<8x384xf32> to vector<8x128xf32>
    %12 = vector.extract_strided_slice %9 {offsets = [0, 128], sizes = [8, 128], strides = [1, 1]} : vector<8x384xf32> to vector<8x128xf32>
    %13 = vector.extract_strided_slice %9 {offsets = [0, 256], sizes = [8, 128], strides = [1, 1]} : vector<8x384xf32> to vector<8x128xf32>
    %14 = vector.extract_strided_slice %10 {offsets = [0, 0], sizes = [8, 128], strides = [1, 1]} : vector<8x384xf32> to vector<8x128xf32>
    %15 = vector.extract_strided_slice %10 {offsets = [0, 128], sizes = [8, 128], strides = [1, 1]} : vector<8x384xf32> to vector<8x128xf32>
    %16 = vector.extract_strided_slice %10 {offsets = [0, 256], sizes = [8, 128], strides = [1, 1]} : vector<8x384xf32> to vector<8x128xf32>
    %17 = arith.addf %11, %14 : vector<8x128xf32>
    %18 = arith.negf %17 : vector<8x128xf32>
    %19 = math.exp %18 : vector<8x128xf32>
    %cst_11 = arith.constant 1.000000e+00 : f32
    %20 = vector.broadcast %cst_11 : f32 to vector<8x128xf32>
    %21 = arith.addf %20, %19 : vector<8x128xf32>
    %22 = arith.divf %20, %21 : vector<8x128xf32>
    %23 = arith.addf %12, %15 : vector<8x128xf32>
    %24 = arith.negf %23 : vector<8x128xf32>
    %25 = math.exp %24 : vector<8x128xf32>
    %cst_12 = arith.constant 1.000000e+00 : f32
    %26 = vector.broadcast %cst_12 : f32 to vector<8x128xf32>
    %27 = arith.addf %26, %25 : vector<8x128xf32>
    %28 = arith.divf %26, %27 : vector<8x128xf32>
    %29 = vector.broadcast %7 : vector<1x128xf32> to vector<8x128xf32>
    %30 = arith.addf %16, %29 : vector<8x128xf32>
    %31 = arith.mulf %22, %30 : vector<8x128xf32>
    %32 = arith.addf %13, %31 : vector<8x128xf32>
    %33 = math.tanh %32 : vector<8x128xf32>
    %cst_13 = arith.constant 1.000000e+00 : f32
    %34 = vector.broadcast %cst_13 : f32 to vector<8x128xf32>
    %35 = arith.subf %34, %28 : vector<8x128xf32>
    %36 = arith.mulf %35, %33 : vector<8x128xf32>
    %37 = arith.mulf %28, %8 : vector<8x128xf32>
    %38 = arith.addf %36, %37 : vector<8x128xf32>
    %39 = vector.extract_strided_slice %5 {offsets = [8, 0], sizes = [8, 384], strides = [1, 1]} : vector<64x384xf32> to vector<8x384xf32>
    %cst_14 = arith.constant dense<0.000000e+00> : vector<8x384xf32>
    %40 = tpu.matmul %38, %6, %cst_14 {dimension_numbers = #tpu.dot_dimension_numbers<[1], [0], [0], [1], [0, 0, 1, 1], [], []>} : vector<8x128xf32>, vector<128x384xf32>, vector<8x384xf32> -> vector<8x384xf32>
    %41 = vector.extract_strided_slice %39 {offsets = [0, 0], sizes = [8, 128], strides = [1, 1]} : vector<8x384xf32> to vector<8x128xf32>
    %42 = vector.extract_strided_slice %39 {offsets = [0, 128], sizes = [8, 128], strides = [1, 1]} : vector<8x384xf32> to vector<8x128xf32>
    %43 = vector.extract_strided_slice %39 {offsets = [0, 256], sizes = [8, 128], strides = [1, 1]} : vector<8x384xf32> to vector<8x128xf32>
    %44 = vector.extract_strided_slice %40 {offsets = [0, 0], sizes = [8, 128], strides = [1, 1]} : vector<8x384xf32> to vector<8x128xf32>
    %45 = vector.extract_strided_slice %40 {offsets = [0, 128], sizes = [8, 128], strides = [1, 1]} : vector<8x384xf32> to vector<8x128xf32>
    %46 = vector.extract_strided_slice %40 {offsets = [0, 256], sizes = [8, 128], strides = [1, 1]} : vector<8x384xf32> to vector<8x128xf32>
    %47 = arith.addf %41, %44 : vector<8x128xf32>
    %48 = arith.negf %47 : vector<8x128xf32>
    %49 = math.exp %48 : vector<8x128xf32>
    %cst_15 = arith.constant 1.000000e+00 : f32
    %50 = vector.broadcast %cst_15 : f32 to vector<8x128xf32>
    %51 = arith.addf %50, %49 : vector<8x128xf32>
    %52 = arith.divf %50, %51 : vector<8x128xf32>
    %53 = arith.addf %42, %45 : vector<8x128xf32>
    %54 = arith.negf %53 : vector<8x128xf32>
    %55 = math.exp %54 : vector<8x128xf32>
    %cst_16 = arith.constant 1.000000e+00 : f32
    %56 = vector.broadcast %cst_16 : f32 to vector<8x128xf32>
    %57 = arith.addf %56, %55 : vector<8x128xf32>
    %58 = arith.divf %56, %57 : vector<8x128xf32>
    %59 = vector.broadcast %7 : vector<1x128xf32> to vector<8x128xf32>
    %60 = arith.addf %46, %59 : vector<8x128xf32>
    %61 = arith.mulf %52, %60 : vector<8x128xf32>
    %62 = arith.addf %43, %61 : vector<8x128xf32>
    %63 = math.tanh %62 : vector<8x128xf32>
    %cst_17 = arith.constant 1.000000e+00 : f32
    %64 = vector.broadcast %cst_17 : f32 to vector<8x128xf32>
    %65 = arith.subf %64, %58 : vector<8x128xf32>
    %66 = arith.mulf %65, %63 : vector<8x128xf32>
    %67 = arith.mulf %58, %38 : vector<8x128xf32>
    %68 = arith.addf %66, %67 : vector<8x128xf32>
    %69 = vector.extract_strided_slice %5 {offsets = [16, 0], sizes = [8, 384], strides = [1, 1]} : vector<64x384xf32> to vector<8x384xf32>
    %cst_18 = arith.constant dense<0.000000e+00> : vector<8x384xf32>
    %70 = tpu.matmul %68, %6, %cst_18 {dimension_numbers = #tpu.dot_dimension_numbers<[1], [0], [0], [1], [0, 0, 1, 1], [], []>} : vector<8x128xf32>, vector<128x384xf32>, vector<8x384xf32> -> vector<8x384xf32>
    %71 = vector.extract_strided_slice %69 {offsets = [0, 0], sizes = [8, 128], strides = [1, 1]} : vector<8x384xf32> to vector<8x128xf32>
    %72 = vector.extract_strided_slice %69 {offsets = [0, 128], sizes = [8, 128], strides = [1, 1]} : vector<8x384xf32> to vector<8x128xf32>
    %73 = vector.extract_strided_slice %69 {offsets = [0, 256], sizes = [8, 128], strides = [1, 1]} : vector<8x384xf32> to vector<8x128xf32>
    %74 = vector.extract_strided_slice %70 {offsets = [0, 0], sizes = [8, 128], strides = [1, 1]} : vector<8x384xf32> to vector<8x128xf32>
    %75 = vector.extract_strided_slice %70 {offsets = [0, 128], sizes = [8, 128], strides = [1, 1]} : vector<8x384xf32> to vector<8x128xf32>
    %76 = vector.extract_strided_slice %70 {offsets = [0, 256], sizes = [8, 128], strides = [1, 1]} : vector<8x384xf32> to vector<8x128xf32>
    %77 = arith.addf %71, %74 : vector<8x128xf32>
    %78 = arith.negf %77 : vector<8x128xf32>
    %79 = math.exp %78 : vector<8x128xf32>
    %cst_19 = arith.constant 1.000000e+00 : f32
    %80 = vector.broadcast %cst_19 : f32 to vector<8x128xf32>
    %81 = arith.addf %80, %79 : vector<8x128xf32>
    %82 = arith.divf %80, %81 : vector<8x128xf32>
    %83 = arith.addf %72, %75 : vector<8x128xf32>
    %84 = arith.negf %83 : vector<8x128xf32>
    %85 = math.exp %84 : vector<8x128xf32>
    %cst_20 = arith.constant 1.000000e+00 : f32
    %86 = vector.broadcast %cst_20 : f32 to vector<8x128xf32>
    %87 = arith.addf %86, %85 : vector<8x128xf32>
    %88 = arith.divf %86, %87 : vector<8x128xf32>
    %89 = vector.broadcast %7 : vector<1x128xf32> to vector<8x128xf32>
    %90 = arith.addf %76, %89 : vector<8x128xf32>
    %91 = arith.mulf %82, %90 : vector<8x128xf32>
    %92 = arith.addf %73, %91 : vector<8x128xf32>
    %93 = math.tanh %92 : vector<8x128xf32>
    %cst_21 = arith.constant 1.000000e+00 : f32
    %94 = vector.broadcast %cst_21 : f32 to vector<8x128xf32>
    %95 = arith.subf %94, %88 : vector<8x128xf32>
    %96 = arith.mulf %95, %93 : vector<8x128xf32>
    %97 = arith.mulf %88, %68 : vector<8x128xf32>
    %98 = arith.addf %96, %97 : vector<8x128xf32>
    %99 = vector.extract_strided_slice %5 {offsets = [24, 0], sizes = [8, 384], strides = [1, 1]} : vector<64x384xf32> to vector<8x384xf32>
    %cst_22 = arith.constant dense<0.000000e+00> : vector<8x384xf32>
    %100 = tpu.matmul %98, %6, %cst_22 {dimension_numbers = #tpu.dot_dimension_numbers<[1], [0], [0], [1], [0, 0, 1, 1], [], []>} : vector<8x128xf32>, vector<128x384xf32>, vector<8x384xf32> -> vector<8x384xf32>
    %101 = vector.extract_strided_slice %99 {offsets = [0, 0], sizes = [8, 128], strides = [1, 1]} : vector<8x384xf32> to vector<8x128xf32>
    %102 = vector.extract_strided_slice %99 {offsets = [0, 128], sizes = [8, 128], strides = [1, 1]} : vector<8x384xf32> to vector<8x128xf32>
    %103 = vector.extract_strided_slice %99 {offsets = [0, 256], sizes = [8, 128], strides = [1, 1]} : vector<8x384xf32> to vector<8x128xf32>
    %104 = vector.extract_strided_slice %100 {offsets = [0, 0], sizes = [8, 128], strides = [1, 1]} : vector<8x384xf32> to vector<8x128xf32>
    %105 = vector.extract_strided_slice %100 {offsets = [0, 128], sizes = [8, 128], strides = [1, 1]} : vector<8x384xf32> to vector<8x128xf32>
    %106 = vector.extract_strided_slice %100 {offsets = [0, 256], sizes = [8, 128], strides = [1, 1]} : vector<8x384xf32> to vector<8x128xf32>
    %107 = arith.addf %101, %104 : vector<8x128xf32>
    %108 = arith.negf %107 : vector<8x128xf32>
    %109 = math.exp %108 : vector<8x128xf32>
    %cst_23 = arith.constant 1.000000e+00 : f32
    %110 = vector.broadcast %cst_23 : f32 to vector<8x128xf32>
    %111 = arith.addf %110, %109 : vector<8x128xf32>
    %112 = arith.divf %110, %111 : vector<8x128xf32>
    %113 = arith.addf %102, %105 : vector<8x128xf32>
    %114 = arith.negf %113 : vector<8x128xf32>
    %115 = math.exp %114 : vector<8x128xf32>
    %cst_24 = arith.constant 1.000000e+00 : f32
    %116 = vector.broadcast %cst_24 : f32 to vector<8x128xf32>
    %117 = arith.addf %116, %115 : vector<8x128xf32>
    %118 = arith.divf %116, %117 : vector<8x128xf32>
    %119 = vector.broadcast %7 : vector<1x128xf32> to vector<8x128xf32>
    %120 = arith.addf %106, %119 : vector<8x128xf32>
    %121 = arith.mulf %112, %120 : vector<8x128xf32>
    %122 = arith.addf %103, %121 : vector<8x128xf32>
    %123 = math.tanh %122 : vector<8x128xf32>
    %cst_25 = arith.constant 1.000000e+00 : f32
    %124 = vector.broadcast %cst_25 : f32 to vector<8x128xf32>
    %125 = arith.subf %124, %118 : vector<8x128xf32>
    %126 = arith.mulf %125, %123 : vector<8x128xf32>
    %127 = arith.mulf %118, %98 : vector<8x128xf32>
    %128 = arith.addf %126, %127 : vector<8x128xf32>
    %129 = vector.extract_strided_slice %5 {offsets = [32, 0], sizes = [8, 384], strides = [1, 1]} : vector<64x384xf32> to vector<8x384xf32>
    %cst_26 = arith.constant dense<0.000000e+00> : vector<8x384xf32>
    %130 = tpu.matmul %128, %6, %cst_26 {dimension_numbers = #tpu.dot_dimension_numbers<[1], [0], [0], [1], [0, 0, 1, 1], [], []>} : vector<8x128xf32>, vector<128x384xf32>, vector<8x384xf32> -> vector<8x384xf32>
    %131 = vector.extract_strided_slice %129 {offsets = [0, 0], sizes = [8, 128], strides = [1, 1]} : vector<8x384xf32> to vector<8x128xf32>
    %132 = vector.extract_strided_slice %129 {offsets = [0, 128], sizes = [8, 128], strides = [1, 1]} : vector<8x384xf32> to vector<8x128xf32>
    %133 = vector.extract_strided_slice %129 {offsets = [0, 256], sizes = [8, 128], strides = [1, 1]} : vector<8x384xf32> to vector<8x128xf32>
    %134 = vector.extract_strided_slice %130 {offsets = [0, 0], sizes = [8, 128], strides = [1, 1]} : vector<8x384xf32> to vector<8x128xf32>
    %135 = vector.extract_strided_slice %130 {offsets = [0, 128], sizes = [8, 128], strides = [1, 1]} : vector<8x384xf32> to vector<8x128xf32>
    %136 = vector.extract_strided_slice %130 {offsets = [0, 256], sizes = [8, 128], strides = [1, 1]} : vector<8x384xf32> to vector<8x128xf32>
    %137 = arith.addf %131, %134 : vector<8x128xf32>
    %138 = arith.negf %137 : vector<8x128xf32>
    %139 = math.exp %138 : vector<8x128xf32>
    %cst_27 = arith.constant 1.000000e+00 : f32
    %140 = vector.broadcast %cst_27 : f32 to vector<8x128xf32>
    %141 = arith.addf %140, %139 : vector<8x128xf32>
    %142 = arith.divf %140, %141 : vector<8x128xf32>
    %143 = arith.addf %132, %135 : vector<8x128xf32>
    %144 = arith.negf %143 : vector<8x128xf32>
    %145 = math.exp %144 : vector<8x128xf32>
    %cst_28 = arith.constant 1.000000e+00 : f32
    %146 = vector.broadcast %cst_28 : f32 to vector<8x128xf32>
    %147 = arith.addf %146, %145 : vector<8x128xf32>
    %148 = arith.divf %146, %147 : vector<8x128xf32>
    %149 = vector.broadcast %7 : vector<1x128xf32> to vector<8x128xf32>
    %150 = arith.addf %136, %149 : vector<8x128xf32>
    %151 = arith.mulf %142, %150 : vector<8x128xf32>
    %152 = arith.addf %133, %151 : vector<8x128xf32>
    %153 = math.tanh %152 : vector<8x128xf32>
    %cst_29 = arith.constant 1.000000e+00 : f32
    %154 = vector.broadcast %cst_29 : f32 to vector<8x128xf32>
    %155 = arith.subf %154, %148 : vector<8x128xf32>
    %156 = arith.mulf %155, %153 : vector<8x128xf32>
    %157 = arith.mulf %148, %128 : vector<8x128xf32>
    %158 = arith.addf %156, %157 : vector<8x128xf32>
    %159 = vector.extract_strided_slice %5 {offsets = [40, 0], sizes = [8, 384], strides = [1, 1]} : vector<64x384xf32> to vector<8x384xf32>
    %cst_30 = arith.constant dense<0.000000e+00> : vector<8x384xf32>
    %160 = tpu.matmul %158, %6, %cst_30 {dimension_numbers = #tpu.dot_dimension_numbers<[1], [0], [0], [1], [0, 0, 1, 1], [], []>} : vector<8x128xf32>, vector<128x384xf32>, vector<8x384xf32> -> vector<8x384xf32>
    %161 = vector.extract_strided_slice %159 {offsets = [0, 0], sizes = [8, 128], strides = [1, 1]} : vector<8x384xf32> to vector<8x128xf32>
    %162 = vector.extract_strided_slice %159 {offsets = [0, 128], sizes = [8, 128], strides = [1, 1]} : vector<8x384xf32> to vector<8x128xf32>
    %163 = vector.extract_strided_slice %159 {offsets = [0, 256], sizes = [8, 128], strides = [1, 1]} : vector<8x384xf32> to vector<8x128xf32>
    %164 = vector.extract_strided_slice %160 {offsets = [0, 0], sizes = [8, 128], strides = [1, 1]} : vector<8x384xf32> to vector<8x128xf32>
    %165 = vector.extract_strided_slice %160 {offsets = [0, 128], sizes = [8, 128], strides = [1, 1]} : vector<8x384xf32> to vector<8x128xf32>
    %166 = vector.extract_strided_slice %160 {offsets = [0, 256], sizes = [8, 128], strides = [1, 1]} : vector<8x384xf32> to vector<8x128xf32>
    %167 = arith.addf %161, %164 : vector<8x128xf32>
    %168 = arith.negf %167 : vector<8x128xf32>
    %169 = math.exp %168 : vector<8x128xf32>
    %cst_31 = arith.constant 1.000000e+00 : f32
    %170 = vector.broadcast %cst_31 : f32 to vector<8x128xf32>
    %171 = arith.addf %170, %169 : vector<8x128xf32>
    %172 = arith.divf %170, %171 : vector<8x128xf32>
    %173 = arith.addf %162, %165 : vector<8x128xf32>
    %174 = arith.negf %173 : vector<8x128xf32>
    %175 = math.exp %174 : vector<8x128xf32>
    %cst_32 = arith.constant 1.000000e+00 : f32
    %176 = vector.broadcast %cst_32 : f32 to vector<8x128xf32>
    %177 = arith.addf %176, %175 : vector<8x128xf32>
    %178 = arith.divf %176, %177 : vector<8x128xf32>
    %179 = vector.broadcast %7 : vector<1x128xf32> to vector<8x128xf32>
    %180 = arith.addf %166, %179 : vector<8x128xf32>
    %181 = arith.mulf %172, %180 : vector<8x128xf32>
    %182 = arith.addf %163, %181 : vector<8x128xf32>
    %183 = math.tanh %182 : vector<8x128xf32>
    %cst_33 = arith.constant 1.000000e+00 : f32
    %184 = vector.broadcast %cst_33 : f32 to vector<8x128xf32>
    %185 = arith.subf %184, %178 : vector<8x128xf32>
    %186 = arith.mulf %185, %183 : vector<8x128xf32>
    %187 = arith.mulf %178, %158 : vector<8x128xf32>
    %188 = arith.addf %186, %187 : vector<8x128xf32>
    %189 = vector.extract_strided_slice %5 {offsets = [48, 0], sizes = [8, 384], strides = [1, 1]} : vector<64x384xf32> to vector<8x384xf32>
    %cst_34 = arith.constant dense<0.000000e+00> : vector<8x384xf32>
    %190 = tpu.matmul %188, %6, %cst_34 {dimension_numbers = #tpu.dot_dimension_numbers<[1], [0], [0], [1], [0, 0, 1, 1], [], []>} : vector<8x128xf32>, vector<128x384xf32>, vector<8x384xf32> -> vector<8x384xf32>
    %191 = vector.extract_strided_slice %189 {offsets = [0, 0], sizes = [8, 128], strides = [1, 1]} : vector<8x384xf32> to vector<8x128xf32>
    %192 = vector.extract_strided_slice %189 {offsets = [0, 128], sizes = [8, 128], strides = [1, 1]} : vector<8x384xf32> to vector<8x128xf32>
    %193 = vector.extract_strided_slice %189 {offsets = [0, 256], sizes = [8, 128], strides = [1, 1]} : vector<8x384xf32> to vector<8x128xf32>
    %194 = vector.extract_strided_slice %190 {offsets = [0, 0], sizes = [8, 128], strides = [1, 1]} : vector<8x384xf32> to vector<8x128xf32>
    %195 = vector.extract_strided_slice %190 {offsets = [0, 128], sizes = [8, 128], strides = [1, 1]} : vector<8x384xf32> to vector<8x128xf32>
    %196 = vector.extract_strided_slice %190 {offsets = [0, 256], sizes = [8, 128], strides = [1, 1]} : vector<8x384xf32> to vector<8x128xf32>
    %197 = arith.addf %191, %194 : vector<8x128xf32>
    %198 = arith.negf %197 : vector<8x128xf32>
    %199 = math.exp %198 : vector<8x128xf32>
    %cst_35 = arith.constant 1.000000e+00 : f32
    %200 = vector.broadcast %cst_35 : f32 to vector<8x128xf32>
    %201 = arith.addf %200, %199 : vector<8x128xf32>
    %202 = arith.divf %200, %201 : vector<8x128xf32>
    %203 = arith.addf %192, %195 : vector<8x128xf32>
    %204 = arith.negf %203 : vector<8x128xf32>
    %205 = math.exp %204 : vector<8x128xf32>
    %cst_36 = arith.constant 1.000000e+00 : f32
    %206 = vector.broadcast %cst_36 : f32 to vector<8x128xf32>
    %207 = arith.addf %206, %205 : vector<8x128xf32>
    %208 = arith.divf %206, %207 : vector<8x128xf32>
    %209 = vector.broadcast %7 : vector<1x128xf32> to vector<8x128xf32>
    %210 = arith.addf %196, %209 : vector<8x128xf32>
    %211 = arith.mulf %202, %210 : vector<8x128xf32>
    %212 = arith.addf %193, %211 : vector<8x128xf32>
    %213 = math.tanh %212 : vector<8x128xf32>
    %cst_37 = arith.constant 1.000000e+00 : f32
    %214 = vector.broadcast %cst_37 : f32 to vector<8x128xf32>
    %215 = arith.subf %214, %208 : vector<8x128xf32>
    %216 = arith.mulf %215, %213 : vector<8x128xf32>
    %217 = arith.mulf %208, %188 : vector<8x128xf32>
    %218 = arith.addf %216, %217 : vector<8x128xf32>
    %219 = vector.extract_strided_slice %5 {offsets = [56, 0], sizes = [8, 384], strides = [1, 1]} : vector<64x384xf32> to vector<8x384xf32>
    %cst_38 = arith.constant dense<0.000000e+00> : vector<8x384xf32>
    %220 = tpu.matmul %218, %6, %cst_38 {dimension_numbers = #tpu.dot_dimension_numbers<[1], [0], [0], [1], [0, 0, 1, 1], [], []>} : vector<8x128xf32>, vector<128x384xf32>, vector<8x384xf32> -> vector<8x384xf32>
    %221 = vector.extract_strided_slice %219 {offsets = [0, 0], sizes = [8, 128], strides = [1, 1]} : vector<8x384xf32> to vector<8x128xf32>
    %222 = vector.extract_strided_slice %219 {offsets = [0, 128], sizes = [8, 128], strides = [1, 1]} : vector<8x384xf32> to vector<8x128xf32>
    %223 = vector.extract_strided_slice %219 {offsets = [0, 256], sizes = [8, 128], strides = [1, 1]} : vector<8x384xf32> to vector<8x128xf32>
    %224 = vector.extract_strided_slice %220 {offsets = [0, 0], sizes = [8, 128], strides = [1, 1]} : vector<8x384xf32> to vector<8x128xf32>
    %225 = vector.extract_strided_slice %220 {offsets = [0, 128], sizes = [8, 128], strides = [1, 1]} : vector<8x384xf32> to vector<8x128xf32>
    %226 = vector.extract_strided_slice %220 {offsets = [0, 256], sizes = [8, 128], strides = [1, 1]} : vector<8x384xf32> to vector<8x128xf32>
    %227 = arith.addf %221, %224 : vector<8x128xf32>
    %228 = arith.negf %227 : vector<8x128xf32>
    %229 = math.exp %228 : vector<8x128xf32>
    %cst_39 = arith.constant 1.000000e+00 : f32
    %230 = vector.broadcast %cst_39 : f32 to vector<8x128xf32>
    %231 = arith.addf %230, %229 : vector<8x128xf32>
    %232 = arith.divf %230, %231 : vector<8x128xf32>
    %233 = arith.addf %222, %225 : vector<8x128xf32>
    %234 = arith.negf %233 : vector<8x128xf32>
    %235 = math.exp %234 : vector<8x128xf32>
    %cst_40 = arith.constant 1.000000e+00 : f32
    %236 = vector.broadcast %cst_40 : f32 to vector<8x128xf32>
    %237 = arith.addf %236, %235 : vector<8x128xf32>
    %238 = arith.divf %236, %237 : vector<8x128xf32>
    %239 = vector.broadcast %7 : vector<1x128xf32> to vector<8x128xf32>
    %240 = arith.addf %226, %239 : vector<8x128xf32>
    %241 = arith.mulf %232, %240 : vector<8x128xf32>
    %242 = arith.addf %223, %241 : vector<8x128xf32>
    %243 = math.tanh %242 : vector<8x128xf32>
    %cst_41 = arith.constant 1.000000e+00 : f32
    %244 = vector.broadcast %cst_41 : f32 to vector<8x128xf32>
    %245 = arith.subf %244, %238 : vector<8x128xf32>
    %246 = arith.mulf %245, %243 : vector<8x128xf32>
    %247 = arith.mulf %238, %218 : vector<8x128xf32>
    %248 = arith.addf %246, %247 : vector<8x128xf32>
    %c0_42 = arith.constant 0 : index
    %c0_43 = arith.constant 0 : index
    %249 = vector.load %arg5[%c0_42, %c0_43] : memref<128x45xf32, #tpu.memory_space<vmem>>, vector<128x45xf32>
    %cst_44 = arith.constant dense<0.000000e+00> : vector<8x45xf32>
    %250 = tpu.matmul %248, %249, %cst_44 {dimension_numbers = #tpu.dot_dimension_numbers<[1], [0], [0], [1], [0, 0, 1, 1], [], []>} : vector<8x128xf32>, vector<128x45xf32>, vector<8x45xf32> -> vector<8x45xf32>
    %c0_45 = arith.constant 0 : index
    %c0_46 = arith.constant 0 : index
    %251 = vector.load %arg6[%c0_45, %c0_46] : memref<1x45xf32, #tpu.memory_space<vmem>>, vector<1x45xf32>
    %252 = vector.broadcast %251 : vector<1x45xf32> to vector<8x45xf32>
    %253 = arith.addf %250, %252 : vector<8x45xf32>
    %c0_47 = arith.constant 0 : index
    %c0_48 = arith.constant 0 : index
    %254 = vector.load %arg7[%c0_47, %c0_48] : memref<8x45xf32, #tpu.memory_space<vmem>>, vector<8x45xf32>
    tpu.vector_store %arg7[%c0_47, %c0_48], %253 {strides = array<i32>} : memref<8x45xf32, #tpu.memory_space<vmem>>, vector<8x45xf32>,
    return
  }
}

</mosaic_0001>

<bundles_post_ra>
// kernel: gru_model_forward.1
= control target key start
LH: loop header
LB: loop body
LE: loop exit
PB: predicated region body
PF: predicated region fallthrough
CT: control target
= control target key end

     0   :  { %12 = vsyncpa [#allocation3], 0  ;;  %s3656_s0 = inlined_call_operand.vmem [shape: f32[64,45], index: 0, kind: input, shape index: {}]   ;;  %s3657_s1 = inlined_call_operand.vmem [shape: f32[45,384], index: 1, kind: input, shape index: {}]   ;;  %s3658_s2 = inlined_call_operand.hbm [shape: f32[128,384], index: 2, kind: input, shape index: {}]   ;;  %s3659_s3 = inlined_call_operand.vmem [shape: f32[1,384], index: 3, kind: input, shape index: {}]   ;;  %s3660_s4 = inlined_call_operand.vmem [shape: f32[1,128], index: 4, kind: input, shape index: {}]   ;;  %s3661_s5 = inlined_call_operand.vmem [shape: f32[128,45], index: 5, kind: input, shape index: {}]   ;;  %s3662_s6 = inlined_call_operand.vmem [shape: f32[1,45], index: 6, kind: input, shape index: {}]   ;;  %s3663_s7 = inlined_call_operand.hbm [shape: f32[8,45], index: 7, kind: output, shape index: {}]  }
   0x1   :  { %13 = vsyncpa [#allocation4], 0  ;;  %s3016_s24 = smov [#allocation2]   ;;  %s2968_s28 = scalar_lea.hbm %s3658_s2, 6144 }
   0x2   :  { %s23_s25 = sshll.u32 %s3016_s24, 4  ;;  %p2969_p0 = scmp.ne.s32.totalorder %s3658_s2, %s2968_s28  ;;  %s24_s25 = int_to_ptr.vmem [resolvable:$true] %s23_s25 }
   0x3   :  { %p2972_p1 = scmp.lt.u32.totalorder %s2968_s28, %s3658_s2 }
   0x5   :  { %p2974_p2 = pnand %p2972_p1, %p2969_p0 }
   0x7   :  { %2977 = shalt.err (!%p2974_p2)
}
   0x8   :  { %s2978_s10 = scalar_lea.vmem %s24_s25, 6144  ;;  %p2983_p4 = scmp.lt.s32.totalorder %s24_s25, %s24_s25 }
   0x9   :  { %p2979_p3 = scmp.ne.s32.totalorder %s24_s25, %s2978_s10  ;;  %p2984_p5 = scmp.lt.s32.totalorder %s2978_s10, %s2978_s10 }
   0xb   :  { %p2985_p6 = por %p2984_p5, %p2983_p4 }
   0xd   :  { %p2986_p7 = pnand %p2985_p6, %p2979_p3 }
   0xf   :  { %2989 = shalt.err (!%p2986_p7)
}
  0x10   :  { %s3017_s11 = smov 384   ;;  %s3018_s12 = smov 24  }
  0x11   :  { %29 = dma.hbm_to_vmem [thread:$0]  %s3658_s2, 6144, %s24_s25, [#allocation3], %s3017_s11, %s3017_s11, %s3018_s12  }
  0x12   :  { %3012 = dma.done.wait [#allocation3], 6144  }
  0x13   :  { %3013 = vsyncadd [#allocation3], 4294961152  ;;  %v3019_v0 = vmov 0.0   ;;  %v50_v1 = vld [vmem:[%s3657_s1 + $0x8] sm:$0xff]  ;;  %v53_v2 = vld [vmem:[%s3657_s1 + $0x20] sm:$0xff]  ;;  %vm109_vm0 = vcmask 1044480  }
  0x14   :  { %183 = vmatprep.mubr.f32.mxu0 %v3019_v0  ;;  %v49_v3 = vld [vmem:[%s3657_s1] sm:$0xff]  ;;  %v2348_v4 = vpack.c.bf16 %v53_v2, %v50_v1  ;;  %v52_v5 = vld [vmem:[%s3657_s1 + $0x18] sm:$0xff]  ;;  %v59_v7 = vld [vmem:[%s3657_s1 + $0x50] sm:$0xff]  ;;  %vm84_vm1 = vcmask 367616   ;;  %vm3020_vm2 = vmmov 1   ;;  %vm3022_vm4 = vmmov 0  }
  0x15   :  { %v56_v6 = vld [vmem:[%s3657_s1 + $0x38] sm:$0xff]  ;;  %v2350_v8 = vpack.c.bf16 %v52_v5, %v49_v3  ;;  %v55_v10 = vld [vmem:[%s3657_s1 + $0x30] sm:$0xff]  ;;  %v58_v11 = vld [vmem:[%s3657_s1 + $0x48] sm:$0xff]  ;;  %s3023_s23 = smov [#allocation5]  }
  0x16   :  { %v2352_v9 = vpack.c.bf16 %v59_v7, %v56_v6  ;;  %v62_v12 = vld [vmem:[%s3657_s1 + $0x68] sm:$0xff]  ;;  %2349 = vmatprep.subr.bf16.mxu0 %v2348_v4  ;;  %v65_v13 = vld [vmem:[%s3657_s1 + $0x80] sm:$0x1f]  ;;  %v2354_v14 = vpack.c.bf16 %v58_v11, %v55_v10  ;;  %v64_v18 = vld [vmem:[%s3657_s1 + $0x78] sm:$0x1f]  ;;  %v3021_v4 = vmov 0.0|0.0  }
  0x17   :  { %2351 = vmatpush1.bf16.msra.mxu0 %v2350_v8  ;;  %v41_v15 = vld [vmem:[%s3656_s0] sm:$0xff]  ;;  %v2356_v16 = vpack.c.bf16 %v65_v13, %v62_v12  ;;  %vm3117_vm3 = vmpackc.low %vm109_vm0, %vm3020_vm2  ;;  %v338_v20 = vld [vmem:[#allocation2 + $0x8] sm:$0xff]  ;;  %s1796_s24 = sshll.u32 %s3023_s23, 4  ;;  %s1797_s24 = int_to_ptr.vmem [resolvable:$true] %s1796_s24 }
  0x18   :  { %2353 = vmatprep.subr.bf16.mxu0 %v2352_v9  ;;  %v61_v17 = vld [vmem:[%s3657_s1 + $0x60] sm:$0xff]  ;;  %2021 = vmatprep.mubr.msk.f32.mxu1 %vm84_vm1, %v41_v15  ;;  %v340_v25 = vld [vmem:[#allocation2 + $0x18] sm:$0xff]  ;;  %v347_v27 = vld [vmem:[#allocation2 + $0x50] sm:$0xff]  ;;  %s2990_s25 = scalar_lea.vmem %s1797_s24, 128  ;;  %p2995_p9 = scmp.lt.s32.totalorder %s1797_s24, %s1797_s24 }
  0x19   :  { %v341_v21 = vld [vmem:[#allocation2 + $0x20] sm:$0xff]  ;;  %v2359_v22 = vpack.c.bf16 %v64_v18, %v61_v17  ;;  %v344_v26 = vld [vmem:[#allocation2 + $0x38] sm:$0xff]  ;;  %v51_v28 = vld [vmem:[%s3657_s1 + $0x10] sm:$0xff]  ;;  %p2991_p8 = scmp.ne.s32.totalorder %s1797_s24, %s2990_s25  ;;  %p2996_p10 = scmp.lt.s32.totalorder %s2990_s25, %s2990_s25 }
  0x1a   :  { %v3123_v23 = vpack.c.bf16 %v341_v21, %v338_v20  ;;  %v337_v24 = vld [vmem:[#allocation2] sm:$0xff]  ;;  %v54_v29 = vld [vmem:[%s3657_s1 + $0x28] sm:$0xff]  ;;  %v343_v31 = vld [vmem:[#allocation2 + $0x30] sm:$0xff]  ;;  %v3136_v33 = vpack.c.bf16 %v347_v27, %v344_v26 }
  0x1b   :  { %2355 = vmatpush1.bf16.msra.mxu0 %v2354_v14  ;;  %v3133_v30 = vpack.c.bf16 %v340_v25, %v337_v24  ;;  %v2362_v32 = vpack.c.bf16 %v54_v29, %v51_v28  ;;  %v346_v34 = vld [vmem:[#allocation2 + $0x48] sm:$0xff]  ;;  %v57_v35 = vld [vmem:[%s3657_s1 + $0x40] sm:$0xff]  ;;  %v60_v36 = vld [vmem:[%s3657_s1 + $0x58] sm:$0xff]  ;;  %p2997_p11 = por %p2996_p10, %p2995_p9 }
  0x1c   :  { %2358 = vmatprep.subr.msk.bf16.mxu0 %vm3117_vm3, %v2356_v16  ;;  %v350_v37 = vld [vmem:[#allocation2 + $0x68] sm:$0xff]  ;;  %v353_v38 = vld [vmem:[#allocation2 + $0x80] sm:$0xff]  ;;  %v2366_v39 = vpack.c.bf16 %v60_v36, %v57_v35  ;;  %v63_v40 = vld [vmem:[%s3657_s1 + $0x70] sm:$0xff]  ;;  %v3156_v43 = vpack.c.bf16 %v346_v34, %v343_v31 }
  0x1d   :  { %2363 = vmatprep.subr.bf16.mxu1 %v2362_v32  ;;  %v66_v41 = vld [vmem:[%s3657_s1 + $0x88] sm:$0x1f]  ;;  %v3159_v44 = vpack.c.bf16 %v353_v38, %v350_v37  ;;  %v349_v45 = vld [vmem:[#allocation2 + $0x60] sm:$0xff]  ;;  %v352_v46 = vld [vmem:[#allocation2 + $0x78] sm:$0xff]  ;;  %p2998_p12 = pnand %p2997_p11, %p2991_p8 }
  0x1e   :  { %2365 = vmatpush3.bf16.msra.mxu1 %v2362_v32  ;;  %v42_v42 = vld [vmem:[%s3656_s0 + $0x8] sm:$0xff]  ;;  %v2370_v47 = vpack.c.bf16 %v66_v41, %v63_v40  ;;  %v356_v48 = vld [vmem:[#allocation2 + $0x98] sm:$0xff]  ;;  %v359_v49 = vld [vmem:[#allocation2 + $0xb0] sm:$0xff]  ;;  %v3167_v51 = vpack.c.bf16 %v352_v46, %v349_v45 }
  0x1f   :  { %2361 = vmatpush1.bf16.msk.msra.mxu0 %vm3117_vm3, %v2359_v22  ;;  %2367 = vmatprep.subr.bf16.mxu1 %v2366_v39  ;;  %v43_v50 = vld [vmem:[%s3656_s0 + $0x10] sm:$0xff]  ;;  %v342_v53 = vld [vmem:[#allocation2 + $0x28] sm:$0xff]  ;;  %v3170_v54 = vpack.c.bf16 %v359_v49, %v356_v48  ;;  %v365_v58 = vld [vmem:[#allocation2 + $0xe0] sm:$0xff] }
  0x20   :  { %2377 = vmatprep.subr.bf16.mxu0 %v3123_v23  ;;  %v339_v52 = vld [vmem:[#allocation2 + $0x10] sm:$0xff]  ;;  %v358_v56 = vld [vmem:[#allocation2 + $0xa8] sm:$0xff]  ;;  %v44_v60 = vld [vmem:[%s3656_s0 + $0x18] sm:$0xff] }
  0x21   :  { %v355_v55 = vld [vmem:[#allocation2 + $0x90] sm:$0xff]  ;;  %v362_v57 = vld [vmem:[#allocation2 + $0xc8] sm:$0xff]  ;;  %v3177_v59 = vpack.c.bf16 %v342_v53, %v339_v52  ;;  %v345_v62 = vld [vmem:[#allocation2 + $0x40] sm:$0xff]  ;;  %v69_v53 = vlaneseq }
  0x22   :  { %1807 = vmatmul.mubr.msk.f32.vlgmr.msra.gmra.mrb[0].mxu0 %vm84_vm1, %v41_v15  ;;  %2369 = vmatpush3.bf16.msra.mxu1 %v2366_v39  ;;  %v3184_v61 = vpack.c.bf16 %v358_v56, %v355_v55  ;;  %v348_v63 = vld [vmem:[#allocation2 + $0x58] sm:$0xff]  ;;  %v3187_v1 = vpack.c.bf16 %v365_v58, %v362_v57  ;;  %v361_v2 = vld [vmem:[#allocation2 + $0xc0] sm:$0xff]  ;;  %v371_v6 = vld [vmem:[#allocation2 + $0x110] sm:$0xff] }
  0x23   :  { %2379 = vmatpush1.bf16.msra.mxu0 %v3133_v30  ;;  %189 = vmatprep.mubr.f32.mxu0 %v3019_v0  ;;  %v364_v3 = vld [vmem:[#allocation2 + $0xd8] sm:$0xff]  ;;  %v3193_v7 = vpack.c.bf16 %v348_v63, %v345_v62  ;;  %v45_v8 = vld [vmem:[%s3656_s0 + $0x20] sm:$0xff]  ;;  %v351_v10 = vld [vmem:[#allocation2 + $0x70] sm:$0xff]  ;;  %v70_v55 = vshrl.u32 %v69_v53, 7 }
  0x24   :  { %2381 = vmatprep.subr.bf16.mxu0 %v3136_v33  ;;  %2372 = vmatprep.subr.msk.bf16.mxu1 %vm3117_vm3, %v2370_v47  ;;  %v368_v5 = vld [vmem:[#allocation2 + $0xf8] sm:$0xff]  ;;  %v3200_v9 = vpack.c.bf16 %v364_v3, %v361_v2  ;;  %v354_v11 = vld [vmem:[#allocation2 + $0x88] sm:$0xff]  ;;  %v367_v13 = vld [vmem:[#allocation2 + $0xf0] sm:$0xff] }
  0x25   :  { %v3203_v12 = vpack.c.bf16 %v371_v6, %v368_v5  ;;  %v370_v14 = vld [vmem:[#allocation2 + $0x108] sm:$0xff]  ;;  %v377_v16 = vld [vmem:[#allocation2 + $0x140] sm:$0xff]  ;;  %v3209_v17 = vpack.c.bf16 %v354_v11, %v351_v10  ;;  %v360_v21 = vld [vmem:[#allocation2 + $0xb8] sm:$0xff]  ;;  %v79_v56 = vsub.s32 2, %v70_v55  ;;  %v75_v11 = vsub.s32 1, %v70_v55 }
  0x26   :  { %1808 = vmatmul.mubr.msk.f32.gmra.mrb[2].mxu0 %vm84_vm1, %v42_v42  ;;  %2375 = vmatpush3.bf16.msk.msra.mxu1 %vm3117_vm3, %v2370_v47  ;;  %v374_v15 = vld [vmem:[#allocation2 + $0x128] sm:$0xff]  ;;  %v3216_v19 = vpack.c.bf16 %v370_v14, %v367_v13  ;;  %v357_v20 = vld [vmem:[#allocation2 + $0xa0] sm:$0xff]  ;;  %v376_v25 = vld [vmem:[#allocation2 + $0x138] sm:$0xff] }
  0x27   :  { %2383 = vmatpush1.bf16.msra.mxu0 %v3156_v43  ;;  %195 = vmatprep.mubr.f32.mxu0 %v3019_v0  ;;  %v46_v18 = vld [vmem:[%s3656_s0 + $0x28] sm:$0xff]  ;;  %v3219_v22 = vpack.c.bf16 %v377_v16, %v374_v15  ;;  %v373_v24 = vld [vmem:[#allocation2 + $0x120] sm:$0xff]  ;;  %v380_v26 = vld [vmem:[#allocation2 + $0x158] sm:$0xff]  ;;  %v3225_v28 = vpack.c.bf16 %v360_v21, %v357_v20 }
  0x28   :  { %2385 = vmatprep.subr.bf16.mxu0 %v3159_v44  ;;  %2408 = vmatprep.subr.bf16.mxu1 %v3021_v4  ;;  %v383_v27 = vld [vmem:[#allocation2 + $0x170] sm:$0xff]  ;;  %v3232_v31 = vpack.c.bf16 %v376_v25, %v373_v24  ;;  %v366_v34 = vld [vmem:[#allocation2 + $0xe8] sm:$0xff]  ;;  %v48_v39 = vld [vmem:[%s3656_s0 + $0x38] sm:$0xff] }
  0x29   :  { %2022 = vmatmul.mubr.msk.f32.vlgmr.msra.gmra.mrb[0].mxu1 %vm84_vm1, %v42_v42  ;;  %v47_v29 = vld [vmem:[%s3656_s0 + $0x30] sm:$0xff]  ;;  %v3235_v35 = vpack.c.bf16 %v383_v27, %v380_v26  ;;  %v382_v37 = vld [vmem:[#allocation2 + $0x168] sm:$0xff]  ;;  %v369_v41 = vld [vmem:[#allocation2 + $0x100] sm:$0xff] }
  0x2a   :  { %1809 = vmatmul.mubr.msk.f32.gmra.mrb[4].mxu0 %vm84_vm1, %v43_v50  ;;  %2410 = vmatpush3.bf16.msra.mxu1 %v3177_v59  ;;  %v363_v32 = vld [vmem:[#allocation2 + $0xd0] sm:$0xff]  ;;  %v372_v42 = vld [vmem:[#allocation2 + $0x118] sm:$0xff]  ;;  %v378_v47 = vld [vmem:[#allocation2 + $0x148] sm:$0xff] }
  0x2b   :  { %2387 = vmatpush1.bf16.msra.mxu0 %v3167_v51  ;;  %201 = vmatprep.mubr.f32.mxu0 %v3019_v0  ;;  %v379_v36 = vld [vmem:[#allocation2 + $0x150] sm:$0xff]  ;;  %v3241_v38 = vpack.c.bf16 %v366_v34, %v363_v32  ;;  %v3255_v45 = vpack.c.bf16 %v372_v42, %v369_v41  ;;  %v381_v49 = vld [vmem:[#allocation2 + $0x160] sm:$0xff] }
  0x2c   :  { %2389 = vmatprep.subr.bf16.mxu0 %v3170_v54  ;;  %2411 = vmatprep.subr.bf16.mxu1 %v3021_v4  ;;  %v3248_v40 = vpack.c.bf16 %v382_v37, %v379_v36  ;;  %v375_v46 = vld [vmem:[#allocation2 + $0x130] sm:$0xff]  ;;  %v67_v57 = vld [vmem:[%s3659_s3] sm:$0x7] }
  0x2d   :  { %2024 = vmatprep.mubr.msk.f32.mxu1 %vm84_vm1, %v43_v50  ;;  %v3265_v48 = vpack.c.bf16 %v378_v47, %v375_v46  ;;  %v384_v50 = vld [vmem:[#allocation2 + $0x178] sm:$0xff]  ;;  %v80_v58 = vrot.slane %v67_v57, %v79_v56  ;;  %v3327_v21 = vrot.slane %v67_v57, %v75_v11  ;;  %v3338_v47 = vld [vmem:[%s3660_s4] ss:$0 sm:$0xff] }
  0x2e   :  { %1810 = vmatmul.mubr.msk.f32.gmra.mrb[6].mxu0 %vm84_vm1, %v44_v60  ;;  %2413 = vmatpush3.bf16.msra.mxu1 %v3193_v7  ;;  %v3274_v52 = vpack.c.bf16 %v384_v50, %v381_v49 }
  0x2f   :  { %2391 = vmatpush1.bf16.msra.mxu0 %v3184_v61  ;;  %207 = vmatprep.mubr.f32.mxu0 %v3019_v0 }
  0x30   :  { %2393 = vmatprep.subr.bf16.mxu0 %v3187_v1  ;;  %2414 = vmatprep.subr.bf16.mxu1 %v3021_v4 }
  0x31   :  { %2025 = vmatmul.mubr.msk.f32.gmra.mrb[2].mxu1 %vm84_vm1, %v44_v60 }
  0x32   :  { %1811 = vmatmul.mubr.msk.f32.gmra.mrb[8].mxu0 %vm84_vm1, %v45_v8  ;;  %2416 = vmatpush3.bf16.msra.mxu1 %v3209_v17 }
  0x33   :  { %2395 = vmatpush1.bf16.msra.mxu0 %v3200_v9  ;;  %213 = vmatprep.mubr.f32.mxu0 %v3019_v0 }
  0x34   :  { %2397 = vmatprep.subr.bf16.mxu0 %v3203_v12  ;;  %2417 = vmatprep.subr.bf16.mxu1 %v3021_v4 }
  0x35   :  { %2027 = vmatprep.mubr.msk.f32.mxu1 %vm84_vm1, %v45_v8  ;;  %v71_v8 = vsub.s32 0, %v70_v55 }
  0x36   :  { %1812 = vmatmul.mubr.msk.f32.gmra.mrb[10].mxu0 %vm84_vm1, %v46_v18  ;;  %2419 = vmatpush3.bf16.msra.mxu1 %v3225_v28 }
  0x37   :  { %2399 = vmatpush1.bf16.msra.mxu0 %v3216_v19  ;;  %219 = vmatprep.mubr.f32.mxu0 %v3019_v0  ;;  %v3323_v15 = vrot.slane %v67_v57, %v71_v8 }
  0x38   :  { %2401 = vmatprep.subr.bf16.mxu0 %v3219_v22  ;;  %2420 = vmatprep.subr.bf16.mxu1 %v3021_v4 }
  0x39   :  { %2028 = vmatmul.mubr.msk.f32.gmra.mrb[4].mxu1 %vm84_vm1, %v46_v18 }
  0x3a   :  { %1813 = vmatmul.mubr.msk.f32.gmra.mrb[12].mxu0 %vm84_vm1, %v47_v29  ;;  %2422 = vmatpush3.bf16.msra.mxu1 %v3241_v38 }
  0x3b   :  { %2403 = vmatpush1.bf16.msra.mxu0 %v3232_v31  ;;  %225 = vmatprep.mubr.f32.mxu0 %v3019_v0 }
  0x3c   :  { %2405 = vmatprep.subr.bf16.mxu0 %v3235_v35  ;;  %2423 = vmatprep.subr.bf16.mxu1 %v3021_v4 }
  0x3d   :  { %2030 = vmatprep.mubr.msk.f32.mxu1 %vm84_vm1, %v47_v29 }
  0x3e   :  { %1814 = vmatmul.mubr.msk.f32.gmra.mrb[14].mxu0 %vm84_vm1, %v48_v39  ;;  %2031 = vmatmul.mubr.msk.f32.gmra.mrb[6].mxu1 %vm84_vm1, %v48_v39 }
  0x3f   :  { %2407 = vmatpush1.bf16.msra.mxu0 %v3248_v40  ;;  %450 = vmatprep.mubr.f32.mxu0 %v3019_v0 }
  0x40   :  { %2433 = vmatprep.subr.bf16.mxu0 %v3123_v23  ;;  %2425 = vmatpush3.bf16.msra.mxu1 %v3255_v45 }
  0x41   :  { %2426 = vmatprep.subr.bf16.mxu1 %v3021_v4  ;;  %2065 = vmatprep.mubr.msk.f32.mxu1 %vm3022_vm4, %v3019_v0 }
  0x42   :  { %451 = vmatmul.mubr.f32.vlgmr.msra.gmra.mrb[0].mxu0 %v3019_v0 }
  0x43   :  { %2435 = vmatpush1.bf16.msra.mxu0 %v3133_v30  ;;  %619 = vmatprep.mubr.f32.mxu0 %v3019_v0 }
  0x44   :  { %2437 = vmatprep.subr.bf16.mxu0 %v3136_v33  ;;  %2428 = vmatpush3.bf16.msra.mxu1 %v3265_v48 }
  0x45   :  { %2429 = vmatprep.subr.bf16.mxu1 %v3021_v4 }
  0x47   :  { %2439 = vmatpush1.bf16.msra.mxu0 %v3156_v43 }
  0x48   :  { %2441 = vmatprep.subr.bf16.mxu0 %v3159_v44  ;;  %2431 = vmatpush3.bf16.msra.mxu1 %v3274_v52 }
  0x49   :  { %2464 = vmatprep.subr.bf16.mxu1 %v3021_v4 }
  0x4b   :  { %2443 = vmatpush1.bf16.msra.mxu0 %v3167_v51  ;;  %2066 = vmatmul.mubr.f32.vlgmr.msra.gmra.mrb[8].mxu1 %v3019_v0 }
  0x4c   :  { %2445 = vmatprep.subr.bf16.mxu0 %v3170_v54  ;;  %2466 = vmatpush3.bf16.msra.mxu1 %v3177_v59 }
  0x4d   :  { %2100 = vmatprep.mubr.msk.f32.mxu1 %vm3022_vm4, %v3019_v0  ;;  %2467 = vmatprep.subr.bf16.mxu1 %v3021_v4 }
  0x4f   :  { %2447 = vmatpush1.bf16.msra.mxu0 %v3184_v61 }
  0x50   :  { %2449 = vmatprep.subr.bf16.mxu0 %v3187_v1  ;;  %2469 = vmatpush3.bf16.msra.mxu1 %v3193_v7 }
  0x51   :  { %2470 = vmatprep.subr.bf16.mxu1 %v3021_v4 }
  0x53   :  { %2451 = vmatpush1.bf16.msra.mxu0 %v3200_v9 }
  0x54   :  { %2453 = vmatprep.subr.bf16.mxu0 %v3203_v12  ;;  %2472 = vmatpush3.bf16.msra.mxu1 %v3209_v17 }
  0x55   :  { %2473 = vmatprep.subr.bf16.mxu1 %v3021_v4 }
  0x57   :  { %2455 = vmatpush1.bf16.msra.mxu0 %v3216_v19 }
  0x58   :  { %2457 = vmatprep.subr.bf16.mxu0 %v3219_v22  ;;  %2475 = vmatpush3.bf16.msra.mxu1 %v3225_v28 }
  0x59   :  { %2476 = vmatprep.subr.bf16.mxu1 %v3021_v4 }
  0x5b   :  { %2459 = vmatpush1.bf16.msra.mxu0 %v3232_v31 }
  0x5c   :  { %2461 = vmatprep.subr.bf16.mxu0 %v3235_v35  ;;  %2478 = vmatpush3.bf16.msra.mxu1 %v3241_v38 }
  0x5d   :  { %2479 = vmatprep.subr.bf16.mxu1 %v3021_v4 }
  0x5f   :  { %2463 = vmatpush1.bf16.msra.mxu0 %v3248_v40 }
  0x60   :  { %2489 = vmatprep.subr.bf16.mxu0 %v3123_v23  ;;  %2481 = vmatpush3.bf16.msra.mxu1 %v3255_v45 }
  0x61   :  { %2482 = vmatprep.subr.bf16.mxu1 %v3021_v4 }
  0x64   :  { %2484 = vmatpush3.bf16.msra.mxu1 %v3265_v48 }
  0x65   :  { %2485 = vmatprep.subr.bf16.mxu1 %v3021_v4 }
  0x68   :  { %2487 = vmatpush3.bf16.msra.mxu1 %v3274_v52 }
  0x69   :  { %2520 = vmatprep.subr.bf16.mxu1 %v3021_v4 }
  0xfc   :  { %v2023_v60 = vpop.f32.mrb[0].mxu1 }
  0xfd   :  { %v3315_v62 = vadd.f32 %v2023_v60, %v80_v58  ;;  %v298_v63 = vpop.f32.mrb[1].mxu1 }
  0xfe   :  { %v299_v55 = vadd.f32 %v298_v63, %v80_v58 }
 0x104   :  { %v2026_v2 = vpop.f32.mrb[2].mxu1 }
 0x105   :  { %v3317_v3 = vadd.f32 %v2026_v2, %v80_v58  ;;  %v308_v5 = vpop.f32.mrb[3].mxu1 }
 0x106   :  { %v3319_v6 = vadd.f32 %v308_v5, %v80_v58 }
 0x10c   :  { %v2029_v10 = vpop.f32.mrb[4].mxu1 }
 0x10d   :  { %v3321_v13 = vadd.f32 %v2029_v10, %v80_v58  ;;  %v318_v14 = vpop.f32.mrb[5].mxu1 }
 0x10e   :  { %v3325_v16 = vadd.f32 %v318_v14, %v80_v58 }
 0x111   :  { %v2032_v18 = vpop.f32.mrb[6].mxu1 }
 0x112   :  { %v3329_v24 = vadd.f32 %v2032_v18, %v80_v58  ;;  %v328_v25 = vpop.f32.mrb[7].mxu1 }
 0x113   :  { %v3332_v29 = vadd.f32 %v328_v25, %v80_v58 }
 0x115   :  { %v452_v20 = vpop.f32.mrb[0].mxu0 }
 0x116   :  { %v2848_v26 = vadd.f32 %v452_v20, %v3323_v15  ;;  %v454_v27 = vpop.f32.mrb[1].mxu0 }
 0x117   :  { %v2849_v34 = vadd.f32 %v454_v27, %v3327_v21 }
 0x118   :  { %v1824_v32 = vmul.f32 -1.442695, %v2848_v26 }
 0x119   :  { %v1825_v36 = vmul.f32 -1.442695, %v2849_v34 }
 0x11a   :  { %2888 = vpow2.f32 %v1824_v32 }
 0x11b   :  { %2890 = vpow2.f32 %v1825_v36 }
 0x11e   :  { %v523_v37 = vpop.f32.mrb[8].mxu1 }
 0x11f   :  { %v2067_v39 = vpop.f32.mrb[9].mxu1  ;;  %v547_v50 = vadd.f32 %v3338_v47, %v523_v37 }
 0x124   :  { %v2889_v41 = vpop.eup %2888 }
 0x125   :  { %v531_v42 = vadd.f32 1.0, %v2889_v41  ;;  %v2891_v46 = vpop.eup %2890 }
 0x126   :  { %v538_v49 = vadd.f32 1.0, %v2891_v46 }
 0x127   :  { %2892 = vrcp.f32 %v531_v42 }
 0x128   :  { %2894 = vrcp.f32 %v538_v49 }
 0x131   :  { %v2893_v53 = vpop.eup %2892 }
 0x132   :  { %v548_v56 = vmul.f32 %v2893_v53, %v547_v50  ;;  %v2895_v60 = vpop.eup %2894 }
 0x133   :  { %v551_v2 = vsub.f32 1.0, %v2895_v60  ;;  %v553_v10 = vmul.f32 0.0, %v2895_v60 }
 0x134   :  { %v549_v57 = vadd.f32 %v548_v56, %v299_v55 }
 0x136   :  { %2896 = vtanh.f32 %v549_v57 }
 0x140   :  { %v2897_v5 = vpop.eup %2896 }
 0x141   :  { %v552_v8 = vmul.f32 %v2897_v5, %v551_v2 }
 0x143   :  { %v554_v11 = vadd.f32 %v553_v10, %v552_v8 }
 0x145   :  { %620 = vmatmul.mubr.f32.vlgmr.msra.gmra.mrb[2].mxu0 %v554_v11  ;;  %2101 = vmatmul.mubr.f32.vlgmr.msra.gmra.mrb[10].mxu1 %v554_v11 }
 0x146   :  { %2491 = vmatpush1.bf16.msra.mxu0 %v3133_v30  ;;  %2522 = vmatpush3.bf16.msra.mxu1 %v3177_v59 }
 0x147   :  { %2493 = vmatprep.subr.bf16.mxu0 %v3136_v33  ;;  %2523 = vmatprep.subr.bf16.mxu1 %v3021_v4 }
 0x148   :  { %782 = vmatprep.mubr.f32.mxu0 %v3019_v0  ;;  %2135 = vmatprep.mubr.msk.f32.mxu1 %vm3022_vm4, %v3019_v0 }
 0x14a   :  { %2495 = vmatpush1.bf16.msra.mxu0 %v3156_v43  ;;  %2525 = vmatpush3.bf16.msra.mxu1 %v3193_v7 }
 0x14b   :  { %2497 = vmatprep.subr.bf16.mxu0 %v3159_v44  ;;  %2526 = vmatprep.subr.bf16.mxu1 %v3021_v4 }
 0x14e   :  { %2499 = vmatpush1.bf16.msra.mxu0 %v3167_v51  ;;  %2528 = vmatpush3.bf16.msra.mxu1 %v3209_v17 }
 0x14f   :  { %2501 = vmatprep.subr.bf16.mxu0 %v3170_v54  ;;  %2529 = vmatprep.subr.bf16.mxu1 %v3021_v4 }
 0x152   :  { %2503 = vmatpush1.bf16.msra.mxu0 %v3184_v61  ;;  %2531 = vmatpush3.bf16.msra.mxu1 %v3225_v28 }
 0x153   :  { %2505 = vmatprep.subr.bf16.mxu0 %v3187_v1  ;;  %2532 = vmatprep.subr.bf16.mxu1 %v3021_v4 }
 0x156   :  { %2507 = vmatpush1.bf16.msra.mxu0 %v3200_v9  ;;  %2534 = vmatpush3.bf16.msra.mxu1 %v3241_v38 }
 0x157   :  { %2509 = vmatprep.subr.bf16.mxu0 %v3203_v12  ;;  %2535 = vmatprep.subr.bf16.mxu1 %v3021_v4 }
 0x15a   :  { %2511 = vmatpush1.bf16.msra.mxu0 %v3216_v19  ;;  %2537 = vmatpush3.bf16.msra.mxu1 %v3255_v45 }
 0x15b   :  { %2513 = vmatprep.subr.bf16.mxu0 %v3219_v22  ;;  %2538 = vmatprep.subr.bf16.mxu1 %v3021_v4 }
 0x15e   :  { %2515 = vmatpush1.bf16.msra.mxu0 %v3232_v31  ;;  %2540 = vmatpush3.bf16.msra.mxu1 %v3265_v48 }
 0x15f   :  { %2517 = vmatprep.subr.bf16.mxu0 %v3235_v35  ;;  %2541 = vmatprep.subr.bf16.mxu1 %v3021_v4 }
 0x162   :  { %2519 = vmatpush1.bf16.msra.mxu0 %v3248_v40  ;;  %2543 = vmatpush3.bf16.msra.mxu1 %v3274_v52 }
 0x163   :  { %2545 = vmatprep.subr.bf16.mxu0 %v3123_v23  ;;  %2576 = vmatprep.subr.bf16.mxu1 %v3021_v4 }
 0x218   :  { %v621_v58 = vpop.f32.mrb[2].mxu0  ;;  %v692_v63 = vpop.f32.mrb[10].mxu1 }
 0x219   :  { %v2850_v14 = vadd.f32 %v621_v58, %v3323_v15  ;;  %v623_v18 = vpop.f32.mrb[3].mxu0  ;;  %v2102_v20 = vpop.f32.mrb[11].mxu1  ;;  %v710_v39 = vadd.f32 %v3338_v47, %v692_v63 }
 0x21a   :  { %v2851_v26 = vadd.f32 %v623_v18, %v3327_v21 }
 0x21b   :  { %v1827_v25 = vmul.f32 -1.442695, %v2850_v14 }
 0x21c   :  { %v1828_v27 = vmul.f32 -1.442695, %v2851_v26 }
 0x21d   :  { %2898 = vpow2.f32 %v1827_v25 }
 0x21e   :  { %2900 = vpow2.f32 %v1828_v27 }
 0x227   :  { %v2899_v32 = vpop.eup %2898 }
 0x228   :  { %v700_v34 = vadd.f32 1.0, %v2899_v32  ;;  %v2901_v36 = vpop.eup %2900 }
 0x229   :  { %v707_v37 = vadd.f32 1.0, %v2901_v36 }
 0x22a   :  { %2902 = vrcp.f32 %v700_v34 }
 0x22b   :  { %2904 = vrcp.f32 %v707_v37 }
 0x234   :  { %v2903_v41 = vpop.eup %2902 }
 0x235   :  { %v711_v42 = vmul.f32 %v2903_v41, %v710_v39  ;;  %v2905_v49 = vpop.eup %2904 }
 0x236   :  { %v714_v50 = vsub.f32 1.0, %v2905_v49  ;;  %v716_v56 = vmul.f32 %v2905_v49, %v554_v11 }
 0x237   :  { %v712_v46 = vadd.f32 %v711_v42, %v3315_v62 }
 0x239   :  { %2906 = vtanh.f32 %v712_v46 }
 0x243   :  { %v2907_v53 = vpop.eup %2906 }
 0x244   :  { %v715_v55 = vmul.f32 %v2907_v53, %v714_v50 }
 0x246   :  { %v717_v57 = vadd.f32 %v716_v56, %v715_v55 }
 0x248   :  { %783 = vmatmul.mubr.f32.vlgmr.msra.gmra.mrb[4].mxu0 %v717_v57  ;;  %2136 = vmatmul.mubr.f32.vlgmr.msra.gmra.mrb[12].mxu1 %v717_v57 }
 0x249   :  { %2547 = vmatpush1.bf16.msra.mxu0 %v3133_v30  ;;  %2578 = vmatpush3.bf16.msra.mxu1 %v3177_v59 }
 0x24a   :  { %2549 = vmatprep.subr.bf16.mxu0 %v3136_v33  ;;  %2579 = vmatprep.subr.bf16.mxu1 %v3021_v4 }
 0x24b   :  { %945 = vmatprep.mubr.f32.mxu0 %v3019_v0  ;;  %2170 = vmatprep.mubr.msk.f32.mxu1 %vm3022_vm4, %v3019_v0 }
 0x24d   :  { %2551 = vmatpush1.bf16.msra.mxu0 %v3156_v43  ;;  %2581 = vmatpush3.bf16.msra.mxu1 %v3193_v7 }
 0x24e   :  { %2553 = vmatprep.subr.bf16.mxu0 %v3159_v44  ;;  %2582 = vmatprep.subr.bf16.mxu1 %v3021_v4 }
 0x251   :  { %2555 = vmatpush1.bf16.msra.mxu0 %v3167_v51  ;;  %2584 = vmatpush3.bf16.msra.mxu1 %v3209_v17 }
 0x252   :  { %2557 = vmatprep.subr.bf16.mxu0 %v3170_v54  ;;  %2585 = vmatprep.subr.bf16.mxu1 %v3021_v4 }
 0x255   :  { %2559 = vmatpush1.bf16.msra.mxu0 %v3184_v61  ;;  %2587 = vmatpush3.bf16.msra.mxu1 %v3225_v28 }
 0x256   :  { %2561 = vmatprep.subr.bf16.mxu0 %v3187_v1  ;;  %2588 = vmatprep.subr.bf16.mxu1 %v3021_v4 }
 0x259   :  { %2563 = vmatpush1.bf16.msra.mxu0 %v3200_v9  ;;  %2590 = vmatpush3.bf16.msra.mxu1 %v3241_v38 }
 0x25a   :  { %2565 = vmatprep.subr.bf16.mxu0 %v3203_v12  ;;  %2591 = vmatprep.subr.bf16.mxu1 %v3021_v4 }
 0x25d   :  { %2567 = vmatpush1.bf16.msra.mxu0 %v3216_v19  ;;  %2593 = vmatpush3.bf16.msra.mxu1 %v3255_v45 }
 0x25e   :  { %2569 = vmatprep.subr.bf16.mxu0 %v3219_v22  ;;  %2594 = vmatprep.subr.bf16.mxu1 %v3021_v4 }
 0x261   :  { %2571 = vmatpush1.bf16.msra.mxu0 %v3232_v31  ;;  %2596 = vmatpush3.bf16.msra.mxu1 %v3265_v48 }
 0x262   :  { %2573 = vmatprep.subr.bf16.mxu0 %v3235_v35  ;;  %2597 = vmatprep.subr.bf16.mxu1 %v3021_v4 }
 0x265   :  { %2575 = vmatpush1.bf16.msra.mxu0 %v3248_v40  ;;  %2599 = vmatpush3.bf16.msra.mxu1 %v3274_v52 }
 0x266   :  { %2601 = vmatprep.subr.bf16.mxu0 %v3123_v23  ;;  %2632 = vmatprep.subr.bf16.mxu1 %v3021_v4 }
 0x31b   :  { %v784_v62 = vpop.f32.mrb[4].mxu0  ;;  %v855_v60 = vpop.f32.mrb[12].mxu1 }
 0x31c   :  { %v2852_v2 = vadd.f32 %v784_v62, %v3323_v15  ;;  %v786_v5 = vpop.f32.mrb[5].mxu0  ;;  %v2137_v8 = vpop.f32.mrb[13].mxu1  ;;  %v873_v25 = vadd.f32 %v3338_v47, %v855_v60 }
 0x31d   :  { %v2853_v11 = vadd.f32 %v786_v5, %v3327_v21 }
 0x31e   :  { %v1829_v10 = vmul.f32 -1.442695, %v2852_v2 }
 0x31f   :  { %v1830_v58 = vmul.f32 -1.442695, %v2853_v11 }
 0x320   :  { %2908 = vpow2.f32 %v1829_v10 }
 0x321   :  { %2910 = vpow2.f32 %v1830_v58 }
 0x32a   :  { %v2909_v63 = vpop.eup %2908 }
 0x32b   :  { %v863_v14 = vadd.f32 1.0, %v2909_v63  ;;  %v2911_v18 = vpop.eup %2910 }
 0x32c   :  { %v870_v20 = vadd.f32 1.0, %v2911_v18 }
 0x32d   :  { %2912 = vrcp.f32 %v863_v14 }
 0x32e   :  { %2914 = vrcp.f32 %v870_v20 }
 0x337   :  { %v2913_v26 = vpop.eup %2912 }
 0x338   :  { %v874_v27 = vmul.f32 %v2913_v26, %v873_v25  ;;  %v2915_v34 = vpop.eup %2914 }
 0x339   :  { %v877_v36 = vsub.f32 1.0, %v2915_v34  ;;  %v879_v41 = vmul.f32 %v2915_v34, %v717_v57 }
 0x33a   :  { %v875_v32 = vadd.f32 %v874_v27, %v3319_v6 }
 0x33c   :  { %2916 = vtanh.f32 %v875_v32 }
 0x346   :  { %v2917_v37 = vpop.eup %2916 }
 0x347   :  { %v878_v39 = vmul.f32 %v2917_v37, %v877_v36 }
 0x349   :  { %v880_v42 = vadd.f32 %v879_v41, %v878_v39 }
 0x34b   :  { %946 = vmatmul.mubr.f32.vlgmr.msra.gmra.mrb[6].mxu0 %v880_v42  ;;  %2171 = vmatmul.mubr.f32.vlgmr.msra.gmra.mrb[14].mxu1 %v880_v42 }
 0x34c   :  { %2603 = vmatpush1.bf16.msra.mxu0 %v3133_v30  ;;  %2634 = vmatpush3.bf16.msra.mxu1 %v3177_v59 }
 0x34d   :  { %2605 = vmatprep.subr.bf16.mxu0 %v3136_v33  ;;  %2635 = vmatprep.subr.bf16.mxu1 %v3021_v4 }
 0x34e   :  { %1108 = vmatprep.mubr.f32.mxu0 %v3019_v0  ;;  %2205 = vmatprep.mubr.msk.f32.mxu1 %vm3022_vm4, %v3019_v0 }
 0x350   :  { %2607 = vmatpush1.bf16.msra.mxu0 %v3156_v43  ;;  %2637 = vmatpush3.bf16.msra.mxu1 %v3193_v7 }
 0x351   :  { %2609 = vmatprep.subr.bf16.mxu0 %v3159_v44  ;;  %2638 = vmatprep.subr.bf16.mxu1 %v3021_v4 }
 0x354   :  { %2611 = vmatpush1.bf16.msra.mxu0 %v3167_v51  ;;  %2640 = vmatpush3.bf16.msra.mxu1 %v3209_v17 }
 0x355   :  { %2613 = vmatprep.subr.bf16.mxu0 %v3170_v54  ;;  %2641 = vmatprep.subr.bf16.mxu1 %v3021_v4 }
 0x358   :  { %2615 = vmatpush1.bf16.msra.mxu0 %v3184_v61  ;;  %2643 = vmatpush3.bf16.msra.mxu1 %v3225_v28 }
 0x359   :  { %2617 = vmatprep.subr.bf16.mxu0 %v3187_v1  ;;  %2644 = vmatprep.subr.bf16.mxu1 %v3021_v4 }
 0x35c   :  { %2619 = vmatpush1.bf16.msra.mxu0 %v3200_v9  ;;  %2646 = vmatpush3.bf16.msra.mxu1 %v3241_v38 }
 0x35d   :  { %2621 = vmatprep.subr.bf16.mxu0 %v3203_v12  ;;  %2647 = vmatprep.subr.bf16.mxu1 %v3021_v4 }
 0x360   :  { %2623 = vmatpush1.bf16.msra.mxu0 %v3216_v19  ;;  %2649 = vmatpush3.bf16.msra.mxu1 %v3255_v45 }
 0x361   :  { %2625 = vmatprep.subr.bf16.mxu0 %v3219_v22  ;;  %2650 = vmatprep.subr.bf16.mxu1 %v3021_v4 }
 0x364   :  { %2627 = vmatpush1.bf16.msra.mxu0 %v3232_v31  ;;  %2652 = vmatpush3.bf16.msra.mxu1 %v3265_v48 }
 0x365   :  { %2629 = vmatprep.subr.bf16.mxu0 %v3235_v35  ;;  %2653 = vmatprep.subr.bf16.mxu1 %v3021_v4 }
 0x368   :  { %2631 = vmatpush1.bf16.msra.mxu0 %v3248_v40  ;;  %2655 = vmatpush3.bf16.msra.mxu1 %v3274_v52 }
 0x369   :  { %2657 = vmatprep.subr.bf16.mxu0 %v3123_v23  ;;  %2688 = vmatprep.subr.bf16.mxu1 %v3021_v4 }
 0x41e   :  { %v947_v6 = vpop.f32.mrb[6].mxu0  ;;  %v1018_v46 = vpop.f32.mrb[14].mxu1 }
 0x41f   :  { %v2854_v49 = vadd.f32 %v947_v6, %v3323_v15  ;;  %v949_v50 = vpop.f32.mrb[7].mxu0  ;;  %v2172_v53 = vpop.f32.mrb[15].mxu1  ;;  %v1036_v8 = vadd.f32 %v3338_v47, %v1018_v46 }
 0x420   :  { %v2855_v56 = vadd.f32 %v949_v50, %v3327_v21 }
 0x421   :  { %v1831_v55 = vmul.f32 -1.442695, %v2854_v49 }
 0x422   :  { %v1832_v57 = vmul.f32 -1.442695, %v2855_v56 }
 0x423   :  { %2918 = vpow2.f32 %v1831_v55 }
 0x424   :  { %2920 = vpow2.f32 %v1832_v57 }
 0x42d   :  { %v2919_v62 = vpop.eup %2918 }
 0x42e   :  { %v1026_v60 = vadd.f32 1.0, %v2919_v62  ;;  %v2921_v2 = vpop.eup %2920 }
 0x42f   :  { %v1033_v5 = vadd.f32 1.0, %v2921_v2 }
 0x430   :  { %2922 = vrcp.f32 %v1026_v60 }
 0x431   :  { %2924 = vrcp.f32 %v1033_v5 }
 0x43a   :  { %v2923_v10 = vpop.eup %2922 }
 0x43b   :  { %v1037_v11 = vmul.f32 %v2923_v10, %v1036_v8  ;;  %v2925_v63 = vpop.eup %2924 }
 0x43c   :  { %v1040_v14 = vsub.f32 1.0, %v2925_v63  ;;  %v1042_v25 = vmul.f32 %v2925_v63, %v880_v42 }
 0x43d   :  { %v1038_v58 = vadd.f32 %v1037_v11, %v3317_v3 }
 0x43f   :  { %2926 = vtanh.f32 %v1038_v58 }
 0x449   :  { %v2927_v18 = vpop.eup %2926 }
 0x44a   :  { %v1041_v20 = vmul.f32 %v2927_v18, %v1040_v14 }
 0x44c   :  { %v1043_v26 = vadd.f32 %v1042_v25, %v1041_v20 }
 0x44e   :  { %1109 = vmatmul.mubr.f32.vlgmr.msra.gmra.mrb[8].mxu0 %v1043_v26  ;;  %2206 = vmatmul.mubr.f32.vlgmr.msra.gmra.mrb[16].mxu1 %v1043_v26 }
 0x44f   :  { %2659 = vmatpush1.bf16.msra.mxu0 %v3133_v30  ;;  %2690 = vmatpush3.bf16.msra.mxu1 %v3177_v59 }
 0x450   :  { %2661 = vmatprep.subr.bf16.mxu0 %v3136_v33  ;;  %2691 = vmatprep.subr.bf16.mxu1 %v3021_v4 }
 0x451   :  { %1271 = vmatprep.mubr.f32.mxu0 %v3019_v0  ;;  %2240 = vmatprep.mubr.msk.f32.mxu1 %vm3022_vm4, %v3019_v0 }
 0x453   :  { %2663 = vmatpush1.bf16.msra.mxu0 %v3156_v43  ;;  %2693 = vmatpush3.bf16.msra.mxu1 %v3193_v7 }
 0x454   :  { %2665 = vmatprep.subr.bf16.mxu0 %v3159_v44  ;;  %2694 = vmatprep.subr.bf16.mxu1 %v3021_v4 }
 0x457   :  { %2667 = vmatpush1.bf16.msra.mxu0 %v3167_v51  ;;  %2696 = vmatpush3.bf16.msra.mxu1 %v3209_v17 }
 0x458   :  { %2669 = vmatprep.subr.bf16.mxu0 %v3170_v54  ;;  %2697 = vmatprep.subr.bf16.mxu1 %v3021_v4 }
 0x45b   :  { %2671 = vmatpush1.bf16.msra.mxu0 %v3184_v61  ;;  %2699 = vmatpush3.bf16.msra.mxu1 %v3225_v28 }
 0x45c   :  { %2673 = vmatprep.subr.bf16.mxu0 %v3187_v1  ;;  %2700 = vmatprep.subr.bf16.mxu1 %v3021_v4 }
 0x45f   :  { %2675 = vmatpush1.bf16.msra.mxu0 %v3200_v9  ;;  %2702 = vmatpush3.bf16.msra.mxu1 %v3241_v38 }
 0x460   :  { %2677 = vmatprep.subr.bf16.mxu0 %v3203_v12  ;;  %2703 = vmatprep.subr.bf16.mxu1 %v3021_v4 }
 0x463   :  { %2679 = vmatpush1.bf16.msra.mxu0 %v3216_v19  ;;  %2705 = vmatpush3.bf16.msra.mxu1 %v3255_v45 }
 0x464   :  { %2681 = vmatprep.subr.bf16.mxu0 %v3219_v22  ;;  %2706 = vmatprep.subr.bf16.mxu1 %v3021_v4 }
 0x467   :  { %2683 = vmatpush1.bf16.msra.mxu0 %v3232_v31  ;;  %2708 = vmatpush3.bf16.msra.mxu1 %v3265_v48 }
 0x468   :  { %2685 = vmatprep.subr.bf16.mxu0 %v3235_v35  ;;  %2709 = vmatprep.subr.bf16.mxu1 %v3021_v4 }
 0x46b   :  { %2687 = vmatpush1.bf16.msra.mxu0 %v3248_v40  ;;  %2711 = vmatpush3.bf16.msra.mxu1 %v3274_v52 }
 0x46c   :  { %2713 = vmatprep.subr.bf16.mxu0 %v3123_v23  ;;  %2744 = vmatprep.subr.bf16.mxu1 %v3021_v4 }
 0x521   :  { %v1110_v3 = vpop.f32.mrb[8].mxu0  ;;  %v1181_v27 = vpop.f32.mrb[16].mxu1 }
 0x522   :  { %v2856_v32 = vadd.f32 %v1110_v3, %v3323_v15  ;;  %v1112_v34 = vpop.f32.mrb[9].mxu0  ;;  %v2207_v36 = vpop.f32.mrb[17].mxu1  ;;  %v1199_v50 = vadd.f32 %v3338_v47, %v1181_v27 }
 0x523   :  { %v2857_v39 = vadd.f32 %v1112_v34, %v3327_v21 }
 0x524   :  { %v1833_v37 = vmul.f32 -1.442695, %v2856_v32 }
 0x525   :  { %v1834_v41 = vmul.f32 -1.442695, %v2857_v39 }
 0x526   :  { %2928 = vpow2.f32 %v1833_v37 }
 0x527   :  { %2930 = vpow2.f32 %v1834_v41 }
 0x530   :  { %v2929_v42 = vpop.eup %2928 }
 0x531   :  { %v1189_v6 = vadd.f32 1.0, %v2929_v42  ;;  %v2931_v46 = vpop.eup %2930 }
 0x532   :  { %v1196_v49 = vadd.f32 1.0, %v2931_v46 }
 0x533   :  { %2932 = vrcp.f32 %v1189_v6 }
 0x534   :  { %2934 = vrcp.f32 %v1196_v49  ;;  %v1698_v49 = vld [vmem:[%s3661_s5 + $0x10] sm:$0xff] }
 0x53d   :  { %v2933_v53 = vpop.eup %2932 }
 0x53e   :  { %v1200_v55 = vmul.f32 %v2933_v53, %v1199_v50  ;;  %v2935_v57 = vpop.eup %2934  ;;  %v1700_v53 = vld [vmem:[%s3661_s5 + $0x20] sm:$0xff] }
 0x53f   :  { %v1203_v62 = vsub.f32 1.0, %v2935_v57  ;;  %v1205_v5 = vmul.f32 %v2935_v57, %v1043_v26  ;;  %v1702_v57 = vld [vmem:[%s3661_s5 + $0x30] sm:$0xff] }
 0x540   :  { %v1201_v56 = vadd.f32 %v1200_v55, %v3325_v16  ;;  %v1701_v55 = vld [vmem:[%s3661_s5 + $0x28] sm:$0xff] }
 0x542   :  { %2936 = vtanh.f32 %v1201_v56  ;;  %v2831_v56 = vpack.c.bf16 %v1701_v55, %v1700_v53 }
 0x54c   :  { %v2937_v60 = vpop.eup %2936 }
 0x54d   :  { %v1204_v2 = vmul.f32 %v2937_v60, %v1203_v62  ;;  %v1703_v62 = vld [vmem:[%s3661_s5 + $0x38] sm:$0xff] }
 0x54e   :  { %v2834_v60 = vpack.c.bf16 %v1703_v62, %v1702_v57 }
 0x54f   :  { %v1206_v8 = vadd.f32 %v1205_v5, %v1204_v2  ;;  %v1704_v2 = vld [vmem:[%s3661_s5 + $0x40] sm:$0xff]  ;;  %v1705_v5 = vld [vmem:[%s3661_s5 + $0x48] sm:$0xff] }
 0x551   :  { %1272 = vmatmul.mubr.f32.vlgmr.msra.gmra.mrb[10].mxu0 %v1206_v8  ;;  %2241 = vmatmul.mubr.f32.vlgmr.msra.gmra.mrb[18].mxu1 %v1206_v8 }
 0x552   :  { %2715 = vmatpush1.bf16.msra.mxu0 %v3133_v30  ;;  %2746 = vmatpush3.bf16.msra.mxu1 %v3177_v59 }
 0x553   :  { %2717 = vmatprep.subr.bf16.mxu0 %v3136_v33  ;;  %2747 = vmatprep.subr.bf16.mxu1 %v3021_v4 }
 0x554   :  { %1434 = vmatprep.mubr.f32.mxu0 %v3019_v0  ;;  %2275 = vmatprep.mubr.msk.f32.mxu1 %vm3022_vm4, %v3019_v0 }
 0x556   :  { %2719 = vmatpush1.bf16.msra.mxu0 %v3156_v43  ;;  %2749 = vmatpush3.bf16.msra.mxu1 %v3193_v7 }
 0x557   :  { %2721 = vmatprep.subr.bf16.mxu0 %v3159_v44  ;;  %2750 = vmatprep.subr.bf16.mxu1 %v3021_v4 }
 0x55a   :  { %2723 = vmatpush1.bf16.msra.mxu0 %v3167_v51  ;;  %2752 = vmatpush3.bf16.msra.mxu1 %v3209_v17 }
 0x55b   :  { %2725 = vmatprep.subr.bf16.mxu0 %v3170_v54  ;;  %2753 = vmatprep.subr.bf16.mxu1 %v3021_v4 }
 0x55e   :  { %2727 = vmatpush1.bf16.msra.mxu0 %v3184_v61  ;;  %2755 = vmatpush3.bf16.msra.mxu1 %v3225_v28 }
 0x55f   :  { %2729 = vmatprep.subr.bf16.mxu0 %v3187_v1  ;;  %2756 = vmatprep.subr.bf16.mxu1 %v3021_v4 }
 0x562   :  { %2731 = vmatpush1.bf16.msra.mxu0 %v3200_v9  ;;  %2758 = vmatpush3.bf16.msra.mxu1 %v3241_v38 }
 0x563   :  { %2733 = vmatprep.subr.bf16.mxu0 %v3203_v12  ;;  %2759 = vmatprep.subr.bf16.mxu1 %v3021_v4 }
 0x566   :  { %2735 = vmatpush1.bf16.msra.mxu0 %v3216_v19  ;;  %2761 = vmatpush3.bf16.msra.mxu1 %v3255_v45 }
 0x567   :  { %2737 = vmatprep.subr.bf16.mxu0 %v3219_v22  ;;  %2762 = vmatprep.subr.bf16.mxu1 %v3021_v4 }
 0x56a   :  { %2739 = vmatpush1.bf16.msra.mxu0 %v3232_v31  ;;  %2764 = vmatpush3.bf16.msra.mxu1 %v3265_v48 }
 0x56b   :  { %2741 = vmatprep.subr.bf16.mxu0 %v3235_v35  ;;  %2765 = vmatprep.subr.bf16.mxu1 %v3021_v4 }
 0x56e   :  { %2743 = vmatpush1.bf16.msra.mxu0 %v3248_v40  ;;  %2767 = vmatpush3.bf16.msra.mxu1 %v3274_v52 }
 0x56f   :  { %2769 = vmatprep.subr.bf16.mxu0 %v3123_v23  ;;  %2800 = vmatprep.subr.bf16.mxu1 %v3021_v4 }
 0x624   :  { %v1273_v16 = vpop.f32.mrb[10].mxu0  ;;  %v1344_v10 = vpop.f32.mrb[18].mxu1 }
 0x625   :  { %v2858_v11 = vadd.f32 %v1273_v16, %v3323_v15  ;;  %v1275_v58 = vpop.f32.mrb[11].mxu0  ;;  %v2242_v63 = vpop.f32.mrb[19].mxu1  ;;  %v1362_v23 = vadd.f32 %v3338_v47, %v1344_v10  ;;  %v1706_v16 = vld [vmem:[%s3661_s5 + $0x50] sm:$0xff]  ;;  %v1707_v10 = vld [vmem:[%s3661_s5 + $0x58] sm:$0xff] }
 0x626   :  { %v2859_v18 = vadd.f32 %v1275_v58, %v3327_v21  ;;  %v1708_v58 = vld [vmem:[%s3661_s5 + $0x60] sm:$0xff]  ;;  %v1709_v63 = vld [vmem:[%s3661_s5 + $0x68] sm:$0xff] }
 0x627   :  { %v1835_v14 = vmul.f32 -1.442695, %v2858_v11  ;;  %v2840_v11 = vpack.c.bf16 %v1707_v10, %v1706_v16 }
 0x628   :  { %v1836_v20 = vmul.f32 -1.442695, %v2859_v18  ;;  %v1710_v18 = vld [vmem:[%s3661_s5 + $0x70] sm:$0xff] }
 0x629   :  { %2938 = vpow2.f32 %v1835_v14  ;;  %v2843_v14 = vpack.c.bf16 %v1709_v63, %v1708_v58 }
 0x62a   :  { %2940 = vpow2.f32 %v1836_v20  ;;  %v1711_v20 = vld [vmem:[%s3661_s5 + $0x78] sm:$0xff] }
 0x633   :  { %v2939_v25 = vpop.eup %2938 }
 0x634   :  { %v1352_v26 = vadd.f32 1.0, %v2939_v25  ;;  %v2941_v3 = vpop.eup %2940  ;;  %v2846_v25 = vpack.c.bf16 %v1711_v20, %v1710_v18 }
 0x635   :  { %v1359_v27 = vadd.f32 1.0, %v2941_v3 }
 0x636   :  { %2942 = vrcp.f32 %v1352_v26 }
 0x637   :  { %2944 = vrcp.f32 %v1359_v27 }
 0x640   :  { %v2943_v32 = vpop.eup %2942 }
 0x641   :  { %v1363_v34 = vmul.f32 %v2943_v32, %v1362_v23  ;;  %v2945_v37 = vpop.eup %2944 }
 0x642   :  { %v1366_v39 = vsub.f32 1.0, %v2945_v37  ;;  %v1368_v6 = vmul.f32 %v2945_v37, %v1206_v8  ;;  %v2837_v8 = vpack.c.bf16 %v1705_v5, %v1704_v2 }
 0x643   :  { %v1364_v36 = vadd.f32 %v1363_v34, %v3321_v13  ;;  %v1697_v13 = vld [vmem:[%s3661_s5 + $0x8] sm:$0xff] }
 0x645   :  { %2946 = vtanh.f32 %v1364_v36 }
 0x64f   :  { %v2947_v41 = vpop.eup %2946 }
 0x650   :  { %v1367_v42 = vmul.f32 %v2947_v41, %v1366_v39 }
 0x652   :  { %v1369_v46 = vadd.f32 %v1368_v6, %v1367_v42 }
 0x654   :  { %1435 = vmatmul.mubr.f32.vlgmr.msra.gmra.mrb[12].mxu0 %v1369_v46  ;;  %2276 = vmatmul.mubr.f32.vlgmr.msra.gmra.mrb[20].mxu1 %v1369_v46 }
 0x655   :  { %2771 = vmatpush1.bf16.msra.mxu0 %v3133_v30  ;;  %2802 = vmatpush3.bf16.msra.mxu1 %v3177_v59 }
 0x656   :  { %2773 = vmatprep.subr.bf16.mxu0 %v3136_v33  ;;  %2803 = vmatprep.subr.bf16.mxu1 %v3021_v4 }
 0x657   :  { %1597 = vmatprep.mubr.f32.mxu0 %v3019_v0  ;;  %2310 = vmatprep.mubr.msk.f32.mxu1 %vm3022_vm4, %v3019_v0 }
 0x659   :  { %2775 = vmatpush1.bf16.msra.mxu0 %v3156_v43  ;;  %2805 = vmatpush3.bf16.msra.mxu1 %v3193_v7 }
 0x65a   :  { %2777 = vmatprep.subr.bf16.mxu0 %v3159_v44  ;;  %2806 = vmatprep.subr.bf16.mxu1 %v3021_v4 }
 0x65d   :  { %2779 = vmatpush1.bf16.msra.mxu0 %v3167_v51  ;;  %2808 = vmatpush3.bf16.msra.mxu1 %v3209_v17 }
 0x65e   :  { %2781 = vmatprep.subr.bf16.mxu0 %v3170_v54  ;;  %2809 = vmatprep.subr.bf16.mxu1 %v3021_v4 }
 0x661   :  { %2783 = vmatpush1.bf16.msra.mxu0 %v3184_v61  ;;  %2811 = vmatpush3.bf16.msra.mxu1 %v3225_v28 }
 0x662   :  { %2785 = vmatprep.subr.bf16.mxu0 %v3187_v1  ;;  %2812 = vmatprep.subr.bf16.mxu1 %v3021_v4 }
 0x665   :  { %2787 = vmatpush1.bf16.msra.mxu0 %v3200_v9  ;;  %2814 = vmatpush3.bf16.msra.mxu1 %v3241_v38 }
 0x666   :  { %2789 = vmatprep.subr.bf16.mxu0 %v3203_v12  ;;  %2815 = vmatprep.subr.bf16.mxu1 %v3021_v4 }
 0x669   :  { %2791 = vmatpush1.bf16.msra.mxu0 %v3216_v19  ;;  %2817 = vmatpush3.bf16.msra.mxu1 %v3255_v45 }
 0x66a   :  { %2793 = vmatprep.subr.bf16.mxu0 %v3219_v22  ;;  %2818 = vmatprep.subr.bf16.mxu1 %v3021_v4 }
 0x66d   :  { %2795 = vmatpush1.bf16.msra.mxu0 %v3232_v31  ;;  %2820 = vmatpush3.bf16.msra.mxu1 %v3265_v48 }
 0x66e   :  { %2797 = vmatprep.subr.bf16.mxu0 %v3235_v35  ;;  %2821 = vmatprep.subr.bf16.mxu1 %v3021_v4 }
 0x671   :  { %2799 = vmatpush1.bf16.msra.mxu0 %v3248_v40  ;;  %2823 = vmatpush3.bf16.msra.mxu1 %v3274_v52  ;;  %v1696_v52 = vld [vmem:[%s3661_s5] sm:$0xff] }
 0x672   :  { %2824 = vmatprep.subr.bf16.mxu0 %v3021_v4 }
 0x727   :  { %v1436_v30 = vpop.f32.mrb[12].mxu0  ;;  %v1507_v33 = vpop.f32.mrb[20].mxu1 }
 0x728   :  { %v2860_v43 = vadd.f32 %v1436_v30, %v3323_v15  ;;  %v1438_v44 = vpop.f32.mrb[13].mxu0  ;;  %v2277_v51 = vpop.f32.mrb[21].mxu1  ;;  %v1525_v17 = vadd.f32 %v3338_v47, %v1507_v33 }
 0x729   :  { %v2861_v59 = vadd.f32 %v1438_v44, %v3327_v21 }
 0x72a   :  { %v1837_v54 = vmul.f32 -1.442695, %v2860_v43 }
 0x72b   :  { %v1838_v61 = vmul.f32 -1.442695, %v2861_v59  ;;  %v1841_v59 = vld [vmem:[%s3662_s6] ss:$0 sm:$0xff] }
 0x72c   :  { %2948 = vpow2.f32 %v1837_v54 }
 0x72d   :  { %2950 = vpow2.f32 %v1838_v61 }
 0x736   :  { %v2949_v1 = vpop.eup %2948 }
 0x737   :  { %v1515_v7 = vadd.f32 1.0, %v2949_v1  ;;  %v2951_v9 = vpop.eup %2950 }
 0x738   :  { %v1522_v12 = vadd.f32 1.0, %v2951_v9 }
 0x739   :  { %2952 = vrcp.f32 %v1515_v7 }
 0x73a   :  { %2954 = vrcp.f32 %v1522_v12 }
 0x743   :  { %v2953_v19 = vpop.eup %2952 }
 0x744   :  { %v1526_v22 = vmul.f32 %v2953_v19, %v1525_v17  ;;  %v2955_v31 = vpop.eup %2954 }
 0x745   :  { %v1529_v35 = vsub.f32 1.0, %v2955_v31  ;;  %v1531_v45 = vmul.f32 %v2955_v31, %v1369_v46 }
 0x746   :  { %v1527_v28 = vadd.f32 %v1526_v22, %v3332_v29  ;;  %v2825_v29 = vpack.c.bf16 %v1697_v13, %v1696_v52 }
 0x748   :  { %2956 = vtanh.f32 %v1527_v28 }
 0x752   :  { %v2957_v38 = vpop.eup %2956 }
 0x753   :  { %v1530_v40 = vmul.f32 %v2957_v38, %v1529_v35 }
 0x755   :  { %v3574_v48 = vadd.f32 %v1531_v45, %v1530_v40 }
 0x757   :  { %1598 = vmatmul.mubr.f32.vlgmr.msra.gmra.mrb[14].mxu0 %v3574_v48  ;;  %2311 = vmatmul.mubr.f32.vlgmr.msra.gmra.mrb[22].mxu1 %v3574_v48 }
 0x758   :  { %2345 = vmatprep.mubr.msk.f32.mxu0 %vm3022_vm4, %v3019_v0  ;;  %2826 = vmatpush3.bf16.msra.mxu0 %v2825_v29  ;;  %v1699_v0 = vld [vmem:[%s3661_s5 + $0x18] sm:$0xff] }
 0x759   :  { %2827 = vmatprep.subr.bf16.mxu0 %v3021_v4  ;;  %v2828_v50 = vpack.c.bf16 %v1699_v0, %v1698_v49 }
 0x75c   :  { %2829 = vmatpush3.bf16.msra.mxu0 %v2828_v50 }
 0x75d   :  { %2830 = vmatprep.subr.bf16.mxu0 %v3021_v4 }
 0x760   :  { %2832 = vmatpush3.bf16.msra.mxu0 %v2831_v56 }
 0x761   :  { %2833 = vmatprep.subr.bf16.mxu0 %v3021_v4 }
 0x764   :  { %2835 = vmatpush3.bf16.msra.mxu0 %v2834_v60 }
 0x765   :  { %2836 = vmatprep.subr.bf16.mxu0 %v3021_v4 }
 0x768   :  { %2838 = vmatpush3.bf16.msra.mxu0 %v2837_v8 }
 0x769   :  { %2839 = vmatprep.subr.bf16.mxu0 %v3021_v4 }
 0x76c   :  { %2841 = vmatpush3.bf16.msra.mxu0 %v2840_v11 }
 0x76d   :  { %2842 = vmatprep.subr.bf16.mxu0 %v3021_v4 }
 0x770   :  { %2844 = vmatpush3.bf16.msra.mxu0 %v2843_v14 }
 0x771   :  { %2845 = vmatprep.subr.bf16.mxu0 %v3021_v4 }
 0x774   :  { %2847 = vmatpush3.bf16.msra.mxu0 %v2846_v25 }
 0x82a   :  { %v1599_v26 = vpop.f32.mrb[14].mxu0  ;;  %v1670_v3 = vpop.f32.mrb[22].mxu1 }
 0x82b   :  { %v2862_v27 = vadd.f32 %v1599_v26, %v3323_v15  ;;  %v1601_v23 = vpop.f32.mrb[15].mxu0  ;;  %v2312_v32 = vpop.f32.mrb[23].mxu1  ;;  %v1688_v4 = vadd.f32 %v3338_v47, %v1670_v3 }
 0x82c   :  { %v2863_v36 = vadd.f32 %v1601_v23, %v3327_v21 }
 0x82d   :  { %v1839_v34 = vmul.f32 -1.442695, %v2862_v27 }
 0x82e   :  { %v1840_v37 = vmul.f32 -1.442695, %v2863_v36 }
 0x82f   :  { %2958 = vpow2.f32 %v1839_v34 }
 0x830   :  { %2960 = vpow2.f32 %v1840_v37 }
 0x839   :  { %v2959_v39 = vpop.eup %2958 }
 0x83a   :  { %v1678_v41 = vadd.f32 1.0, %v2959_v39  ;;  %v2961_v42 = vpop.eup %2960 }
 0x83b   :  { %v1685_v6 = vadd.f32 1.0, %v2961_v42 }
 0x83c   :  { %2962 = vrcp.f32 %v1678_v41 }
 0x83d   :  { %2964 = vrcp.f32 %v1685_v6 }
 0x846   :  { %v2963_v46 = vpop.eup %2962 }
 0x847   :  { %v1689_v30 = vmul.f32 %v2963_v46, %v1688_v4  ;;  %v2965_v33 = vpop.eup %2964 }
 0x848   :  { %v1692_v43 = vsub.f32 1.0, %v2965_v33  ;;  %v1694_v51 = vmul.f32 %v2965_v33, %v3574_v48 }
 0x849   :  { %v1690_v15 = vadd.f32 %v1689_v30, %v3329_v24 }
 0x84b   :  { %2966 = vtanh.f32 %v1690_v15 }
 0x855   :  { %v2967_v44 = vpop.eup %2966 }
 0x856   :  { %v1693_v21 = vmul.f32 %v2967_v44, %v1692_v43 }
 0x858   :  { %v1695_v54 = vadd.f32 %v1694_v51, %v1693_v21 }
 0x85a   :  { %2346 = vmatmul.mubr.f32.vlgmr.msra.gmra.mrb[16].mxu0 %v1695_v54 }
 0x92d   :  { %v1785_v47 = vpop.f32.mrb[16].mxu0 }
 0x92e   :  { %v1786_v61 = vadd.f32 %v1841_v59, %v1785_v47  ;;  %v2347_v1 = vpop.f32.mrb[17].mxu0 }
 0x930   :  { %1789 = vst.msk [vmem:[#allocation5] sm:$0xff] %vm84_vm1, %v1786_v61 }
 0x931   :  { %3001 = shalt.err (!%p2998_p12)
}
 0x932   :  { %s3002_s28 = scalar_lea.hbm %s3663_s7, 128 }
 0x933   :  { %p3003_p13 = scmp.ne.s32.totalorder %s3663_s7, %s3002_s28  ;;  %p3006_p0 = scmp.lt.u32.totalorder %s3002_s28, %s3663_s7 }
 0x935   :  { %p3008_p1 = pnand %p3006_p0, %p3003_p13 }
 0x937   :  { %3011 = shalt.err (!%p3008_p1)
}
 0x938   :  { %1799 = dma.vmem_to_hbm [thread:$0]  %s1797_s24, 128, %s3663_s7, [#allocation4]  }
 0x939   :  { %3014 = dma.done.wait [#allocation4], 128  }
 0x93a   :  { %3015 = vsyncadd [#allocation4], 4294967168 }
 0x93b   :  { %1803 = vsyncpa [#allocation3], 1 }
 0x93c   :  { %1804 = vsyncpa [#allocation4], 1 }

</bundles_post_ra>
